<compile_context>
chip_gen: v6e
topology: v6e:2x2x1
jax: 0.10.0
libtpu: 0.0.40
codegen_flags: <defaults>
</compile_context>

<pallas_src>
import functools

import jax
import jax.numpy as jnp
from jax.experimental import pallas as pl
from jax.experimental.pallas import tpu as pltpu


# ----------------------------------------------------------------------------
# Fused kernel: 2 stacked LSTM layers over time + FC on the last hidden state.
# ----------------------------------------------------------------------------
def _lstm_model_kernel(x_ref,            # (T*B, D)  bf16, time-major
                       wx1_ref, wh1_ref, b1_ref,    # (D,4H1) bf16, (H1,4H1) bf16, (1,4H1) f32
                       wx2_ref, wh2_ref, b2_ref,    # (H1,4H2) bf16, (H2,4H2) bf16, (1,4H2) f32
                       fcw_ref, fcb_ref,            # (H2,O) bf16, (1,O) f32
                       out_ref,                     # (B, O) f32
                       h1_buf_ref):                 # (T*B, H1) f32 VMEM scratch
    TB = x_ref.shape[0]
    B = out_ref.shape[0]
    T = TB // B
    H1 = wh1_ref.shape[0]
    H2 = wh2_ref.shape[0]

    def cell(pre, c, H):
        # Full-vreg activations: one tanh for the three logistic gates (sigmoid
        # via 0.5*(tanh(x/2)+1), algebraically exact), one tanh for g, one tanh
        # for the new cell -> 3 EUP pushes per cell (was 5).
        sig = 0.5 * (jnp.tanh(0.5 * pre) + 1.0)
        th = jnp.tanh(pre)
        i_g = sig[:, 0 * H:1 * H]
        f_g = sig[:, 1 * H:2 * H]
        g_g = th[:, 2 * H:3 * H]
        o_g = sig[:, 3 * H:4 * H]
        c_new = f_g * c + i_g * g_g
        h_new = o_g * jnp.tanh(c_new)
        return h_new, c_new

    # ---------------- Layer 1 ----------------
    # Batched input projection for ALL timesteps: one bf16 MXU matmul + one
    # bias broadcast, entirely off the h-dependent serial chain.
    gx1 = (jnp.dot(x_ref[...], wx1_ref[...],
                   preferred_element_type=jnp.float32)
           + b1_ref[...])                       # (T*B, 4H1) f32

    wh1 = wh1_ref[...]                          # bf16, VMEM-resident for all steps
    h1 = jnp.zeros((B, H1), jnp.float32)
    c1 = jnp.zeros((B, H1), jnp.float32)
    # TODO(synk): for large T switch this static unroll to lax.fori_loop with a
    # pl.ds(t*B, B) dynamic slice (static unroll blows up compile time / live
    # ranges); T=8 here is fine.
    for t in range(T):
        pre = gx1[t * B:(t + 1) * B, :] + jnp.dot(
            h1.astype(jnp.bfloat16), wh1, preferred_element_type=jnp.float32)
        h1, c1 = cell(pre, c1, H1)
        h1_buf_ref[t * B:(t + 1) * B, :] = h1
    # TODO(synk): nn.Dropout is identity in eval mode; training-mode dropout
    # would mask h1 / h2 here via pltpu.prng_seed / pltpu.prng_random_bits.

    # ---------------- Layer 2 ----------------
    # Batched input projection of all layer-1 hiddens at once.
    gx2 = (jnp.dot(h1_buf_ref[...].astype(jnp.bfloat16), wx2_ref[...],
                   preferred_element_type=jnp.float32)
           + b2_ref[...])                       # (T*B, 4H2) f32

    wh2 = wh2_ref[...]
    h2 = jnp.zeros((B, H2), jnp.float32)
    c2 = jnp.zeros((B, H2), jnp.float32)
    for t in range(T):
        pre = gx2[t * B:(t + 1) * B, :] + jnp.dot(
            h2.astype(jnp.bfloat16), wh2, preferred_element_type=jnp.float32)
        h2, c2 = cell(pre, c2, H2)

    # ---------------- FC on the last hidden state ----------------
    out_ref[...] = (jnp.dot(h2.astype(jnp.bfloat16), fcw_ref[...],
                            preferred_element_type=jnp.float32)
                    + fcb_ref[...]).astype(out_ref.dtype)


def _full_spec(a):
    n = a.ndim
    return pl.BlockSpec(a.shape, lambda *_: (0,) * n)


@functools.partial(jax.jit, static_argnames=("input_dim",))
def lstm_model_forward(x, params, *, input_dim):
    """x: (B, T, D) batch-first, like PyTorch batch_first=True. Returns (B, n_pred, D)."""
    (wx1, wh1, b1, wx2, wh2, b2, fcw, fcb) = params
    B, T, D = x.shape
    H1 = wh1.shape[0]
    O = fcw.shape[1]

    # Time-major flattened view prepared OUTSIDE the kernel (avoids an in-kernel
    # (B,T,D)->(B*T,D) relayout). MXU operands in bf16, accumulation in f32.
    bf16 = jnp.bfloat16
    x_tm = jnp.transpose(x, (1, 0, 2)).reshape(T * B, D).astype(bf16)
    args = (x_tm,
            wx1.astype(bf16), wh1.astype(bf16), b1,
            wx2.astype(bf16), wh2.astype(bf16), b2,
            fcw.astype(bf16), fcb)

    y = pl.pallas_call(
        _lstm_model_kernel,
        out_shape=jax.ShapeDtypeStruct((B, O), jnp.float32),
        in_specs=[_full_spec(a) for a in args],
        out_specs=pl.BlockSpec((B, O), lambda *_: (0, 0)),
        scratch_shapes=[pltpu.VMEM((T * B, H1), jnp.float32)],
    )(*args)
    return y.reshape(B, -1, input_dim)


# ----------------------------------------------------------------------------
# Parameter construction (deterministic, PyTorch-style uniform init), with
# gates pre-fused into (D, 4H) / (H, 4H) / (1, 4H).
# ----------------------------------------------------------------------------
def init_lstm_params(key, input_dim, hidden_dim):
    k = hidden_dim ** -0.5
    k1, k2, k3, k4 = jax.random.split(key, 4)
    # PyTorch stores (4H, D) / (4H, H) with gate order i, f, g, o.
    w_ih = jax.random.uniform(k1, (4 * hidden_dim, input_dim), jnp.float32, -k, k)
    w_hh = jax.random.uniform(k2, (4 * hidden_dim, hidden_dim), jnp.float32, -k, k)
    b_ih = jax.random.uniform(k3, (4 * hidden_dim,), jnp.float32, -k, k)
    b_hh = jax.random.uniform(k4, (4 * hidden_dim,), jnp.float32, -k, k)

    wx = w_ih.T                                        # (D, 4H), cols = [i|f|g|o]
    wh = w_hh.T                                        # (H, 4H)
    b = (b_ih + b_hh).reshape(1, 4 * hidden_dim)       # (1, 4H)
    return wx, wh, b


def init_fc_params(key, in_dim, out_dim):
    k = in_dim ** -0.5
    k1, k2 = jax.random.split(key)
    w = jax.random.uniform(k1, (out_dim, in_dim), jnp.float32, -k, k)
    b = jax.random.uniform(k2, (out_dim,), jnp.float32, -k, k)
    return w.T, b.reshape(1, out_dim)


# ----------------------------------------------------------------------------
# Pure-JAX f32 reference for verification.
# ----------------------------------------------------------------------------
def _lstm_layer_ref(x, wx, wh, b):
    B, T, D = x.shape
    H = wh.shape[0]

    def step(carry, x_t):
        h, c = carry
        gates = x_t @ wx + h @ wh + b
        i = jax.nn.sigmoid(gates[:, 0 * H:1 * H])
        f = jax.nn.sigmoid(gates[:, 1 * H:2 * H])
        g = jnp.tanh(gates[:, 2 * H:3 * H])
        o = jax.nn.sigmoid(gates[:, 3 * H:4 * H])
        c = f * c + i * g
        h = o * jnp.tanh(c)
        return (h, c), h

    xs = jnp.transpose(x, (1, 0, 2))
    (_, _), hs = jax.lax.scan(step, (jnp.zeros((B, H)), jnp.zeros((B, H))), xs)
    return jnp.transpose(hs, (1, 0, 2))


def _model_ref(x, params, input_dim):
    (wx1, wh1, b1, wx2, wh2, b2, fcw, fcb) = params
    h1 = _lstm_layer_ref(x, wx1, wh1, b1)
    h2 = _lstm_layer_ref(h1, wx2, wh2, b2)
    y = h2[:, -1, :] @ fcw + fcb
    return y.reshape(y.shape[0], -1, input_dim)


if __name__ == "__main__":
    # Model config (small, consistent with the PyTorch module).
    input_dim = 4
    hidden_dims = [32, 32]
    n_predictions = 3
    B, T = 2, 8

    root = jax.random.PRNGKey(0)
    kx, k1, k2, k3 = jax.random.split(root, 4)

    x = jax.random.normal(kx, (B, T, input_dim), jnp.float32)
    wx1, wh1, b1 = init_lstm_params(k1, input_dim, hidden_dims[0])
    wx2, wh2, b2 = init_lstm_params(k2, hidden_dims[0], hidden_dims[1])
    fcw, fcb = init_fc_params(k3, hidden_dims[1], n_predictions * input_dim)
    params = (wx1, wh1, b1, wx2, wh2, b2, fcw, fcb)

    out = lstm_model_forward(x, params, input_dim=input_dim)
    out = jax.block_until_ready(out)

    ref = _model_ref(x, params, input_dim)
    assert out.shape == (B, n_predictions, input_dim), out.shape
    # Tolerance is 2e-2 because matmul operands are intentionally bf16 on the
    # MXU (f32 accumulation, f32 cell state / elementwise); f32 reference.
    assert jnp.allclose(out, ref, atol=2e-2, rtol=2e-2), "mismatch vs reference"

    print("KERNEL_OK")
</pallas_src>

<mosaic_0001>
module attributes {stable_mosaic.version = 11 : i64} {
  func.func @_lstm_model_kernel(%arg0: memref<16x4xbf16, #tpu.memory_space<vmem>>, %arg1: memref<4x128xbf16, #tpu.memory_space<vmem>>, %arg2: memref<32x128xbf16, #tpu.memory_space<vmem>>, %arg3: memref<1x128xf32, #tpu.memory_space<vmem>>, %arg4: memref<32x128xbf16, #tpu.memory_space<vmem>>, %arg5: memref<32x128xbf16, #tpu.memory_space<vmem>>, %arg6: memref<1x128xf32, #tpu.memory_space<vmem>>, %arg7: memref<32x12xbf16, #tpu.memory_space<vmem>>, %arg8: memref<1x12xf32, #tpu.memory_space<vmem>>, %arg9: memref<2x12xf32, #tpu.memory_space<vmem>>, %arg10: memref<16x32xf32, #tpu.memory_space<vmem>>) attributes {dimension_semantics = [], scalar_prefetch = 0 : i64, scratch_operands = 1 : i64, tpu.core_type = #tpu.core_type<tc>} {
    %c0 = arith.constant 0 : index
    %c0_0 = arith.constant 0 : index
    %0 = vector.load %arg0[%c0, %c0_0] : memref<16x4xbf16, #tpu.memory_space<vmem>>, vector<16x4xbf16>
    %c0_1 = arith.constant 0 : index
    %c0_2 = arith.constant 0 : index
    %1 = vector.load %arg1[%c0_1, %c0_2] : memref<4x128xbf16, #tpu.memory_space<vmem>>, vector<4x128xbf16>
    %cst = arith.constant dense<0.000000e+00> : vector<16x128xf32>
    %2 = tpu.matmul %0, %1, %cst {dimension_numbers = #tpu.dot_dimension_numbers<[1], [0], [0], [1], [0, 0, 1, 1], [], []>} : vector<16x4xbf16>, vector<4x128xbf16>, vector<16x128xf32> -> vector<16x128xf32>
    %c0_3 = arith.constant 0 : index
    %c0_4 = arith.constant 0 : index
    %3 = vector.load %arg3[%c0_3, %c0_4] : memref<1x128xf32, #tpu.memory_space<vmem>>, vector<1x128xf32>
    %4 = vector.broadcast %3 : vector<1x128xf32> to vector<16x128xf32>
    %5 = arith.addf %2, %4 : vector<16x128xf32>
    %c0_5 = arith.constant 0 : index
    %c0_6 = arith.constant 0 : index
    %6 = vector.load %arg2[%c0_5, %c0_6] : memref<32x128xbf16, #tpu.memory_space<vmem>>, vector<32x128xbf16>
    %cst_7 = arith.constant 0.000000e+00 : f32
    %7 = vector.broadcast %cst_7 : f32 to vector<2x32xf32>
    %cst_8 = arith.constant 0.000000e+00 : f32
    %8 = vector.broadcast %cst_8 : f32 to vector<2x32xf32>
    %9 = vector.extract_strided_slice %5 {offsets = [0, 0], sizes = [2, 128], strides = [1, 1]} : vector<16x128xf32> to vector<2x128xf32>
    %10 = arith.truncf %7 : vector<2x32xf32> to vector<2x32xbf16>
    %cst_9 = arith.constant dense<0.000000e+00> : vector<2x128xf32>
    %11 = tpu.matmul %10, %6, %cst_9 {dimension_numbers = #tpu.dot_dimension_numbers<[1], [0], [0], [1], [0, 0, 1, 1], [], []>} : vector<2x32xbf16>, vector<32x128xbf16>, vector<2x128xf32> -> vector<2x128xf32>
    %12 = arith.addf %9, %11 : vector<2x128xf32>
    %cst_10 = arith.constant 5.000000e-01 : f32
    %13 = vector.broadcast %cst_10 : f32 to vector<2x128xf32>
    %14 = arith.mulf %13, %12 : vector<2x128xf32>
    %15 = math.tanh %14 : vector<2x128xf32>
    %cst_11 = arith.constant 1.000000e+00 : f32
    %16 = vector.broadcast %cst_11 : f32 to vector<2x128xf32>
    %17 = arith.addf %15, %16 : vector<2x128xf32>
    %cst_12 = arith.constant 5.000000e-01 : f32
    %18 = vector.broadcast %cst_12 : f32 to vector<2x128xf32>
    %19 = arith.mulf %18, %17 : vector<2x128xf32>
    %20 = math.tanh %12 : vector<2x128xf32>
    %21 = vector.extract_strided_slice %19 {offsets = [0, 0], sizes = [2, 32], strides = [1, 1]} : vector<2x128xf32> to vector<2x32xf32>
    %22 = vector.extract_strided_slice %19 {offsets = [0, 32], sizes = [2, 32], strides = [1, 1]} : vector<2x128xf32> to vector<2x32xf32>
    %23 = vector.extract_strided_slice %20 {offsets = [0, 64], sizes = [2, 32], strides = [1, 1]} : vector<2x128xf32> to vector<2x32xf32>
    %24 = vector.extract_strided_slice %19 {offsets = [0, 96], sizes = [2, 32], strides = [1, 1]} : vector<2x128xf32> to vector<2x32xf32>
    %25 = arith.mulf %22, %8 : vector<2x32xf32>
    %26 = arith.mulf %21, %23 : vector<2x32xf32>
    %27 = arith.addf %25, %26 : vector<2x32xf32>
    %28 = math.tanh %27 : vector<2x32xf32>
    %29 = arith.mulf %24, %28 : vector<2x32xf32>
    %c0_13 = arith.constant 0 : index
    %c0_14 = arith.constant 0 : index
    %30 = vector.load %arg10[%c0_13, %c0_14] : memref<16x32xf32, #tpu.memory_space<vmem>>, vector<2x32xf32>
    tpu.vector_store %arg10[%c0_13, %c0_14], %29 {strides = array<i32>} : memref<16x32xf32, #tpu.memory_space<vmem>>, vector<2x32xf32>,
    %31 = vector.extract_strided_slice %5 {offsets = [2, 0], sizes = [2, 128], strides = [1, 1]} : vector<16x128xf32> to vector<2x128xf32>
    %32 = arith.truncf %29 : vector<2x32xf32> to vector<2x32xbf16>
    %cst_15 = arith.constant dense<0.000000e+00> : vector<2x128xf32>
    %33 = tpu.matmul %32, %6, %cst_15 {dimension_numbers = #tpu.dot_dimension_numbers<[1], [0], [0], [1], [0, 0, 1, 1], [], []>} : vector<2x32xbf16>, vector<32x128xbf16>, vector<2x128xf32> -> vector<2x128xf32>
    %34 = arith.addf %31, %33 : vector<2x128xf32>
    %cst_16 = arith.constant 5.000000e-01 : f32
    %35 = vector.broadcast %cst_16 : f32 to vector<2x128xf32>
    %36 = arith.mulf %35, %34 : vector<2x128xf32>
    %37 = math.tanh %36 : vector<2x128xf32>
    %cst_17 = arith.constant 1.000000e+00 : f32
    %38 = vector.broadcast %cst_17 : f32 to vector<2x128xf32>
    %39 = arith.addf %37, %38 : vector<2x128xf32>
    %cst_18 = arith.constant 5.000000e-01 : f32
    %40 = vector.broadcast %cst_18 : f32 to vector<2x128xf32>
    %41 = arith.mulf %40, %39 : vector<2x128xf32>
    %42 = math.tanh %34 : vector<2x128xf32>
    %43 = vector.extract_strided_slice %41 {offsets = [0, 0], sizes = [2, 32], strides = [1, 1]} : vector<2x128xf32> to vector<2x32xf32>
    %44 = vector.extract_strided_slice %41 {offsets = [0, 32], sizes = [2, 32], strides = [1, 1]} : vector<2x128xf32> to vector<2x32xf32>
    %45 = vector.extract_strided_slice %42 {offsets = [0, 64], sizes = [2, 32], strides = [1, 1]} : vector<2x128xf32> to vector<2x32xf32>
    %46 = vector.extract_strided_slice %41 {offsets = [0, 96], sizes = [2, 32], strides = [1, 1]} : vector<2x128xf32> to vector<2x32xf32>
    %47 = arith.mulf %44, %27 : vector<2x32xf32>
    %48 = arith.mulf %43, %45 : vector<2x32xf32>
    %49 = arith.addf %47, %48 : vector<2x32xf32>
    %50 = math.tanh %49 : vector<2x32xf32>
    %51 = arith.mulf %46, %50 : vector<2x32xf32>
    %c2 = arith.constant 2 : index
    %c0_19 = arith.constant 0 : index
    %52 = vector.load %arg10[%c2, %c0_19] : memref<16x32xf32, #tpu.memory_space<vmem>>, vector<2x32xf32>
    tpu.vector_store %arg10[%c2, %c0_19], %51 {strides = array<i32>} : memref<16x32xf32, #tpu.memory_space<vmem>>, vector<2x32xf32>,
    %53 = vector.extract_strided_slice %5 {offsets = [4, 0], sizes = [2, 128], strides = [1, 1]} : vector<16x128xf32> to vector<2x128xf32>
    %54 = arith.truncf %51 : vector<2x32xf32> to vector<2x32xbf16>
    %cst_20 = arith.constant dense<0.000000e+00> : vector<2x128xf32>
    %55 = tpu.matmul %54, %6, %cst_20 {dimension_numbers = #tpu.dot_dimension_numbers<[1], [0], [0], [1], [0, 0, 1, 1], [], []>} : vector<2x32xbf16>, vector<32x128xbf16>, vector<2x128xf32> -> vector<2x128xf32>
    %56 = arith.addf %53, %55 : vector<2x128xf32>
    %cst_21 = arith.constant 5.000000e-01 : f32
    %57 = vector.broadcast %cst_21 : f32 to vector<2x128xf32>
    %58 = arith.mulf %57, %56 : vector<2x128xf32>
    %59 = math.tanh %58 : vector<2x128xf32>
    %cst_22 = arith.constant 1.000000e+00 : f32
    %60 = vector.broadcast %cst_22 : f32 to vector<2x128xf32>
    %61 = arith.addf %59, %60 : vector<2x128xf32>
    %cst_23 = arith.constant 5.000000e-01 : f32
    %62 = vector.broadcast %cst_23 : f32 to vector<2x128xf32>
    %63 = arith.mulf %62, %61 : vector<2x128xf32>
    %64 = math.tanh %56 : vector<2x128xf32>
    %65 = vector.extract_strided_slice %63 {offsets = [0, 0], sizes = [2, 32], strides = [1, 1]} : vector<2x128xf32> to vector<2x32xf32>
    %66 = vector.extract_strided_slice %63 {offsets = [0, 32], sizes = [2, 32], strides = [1, 1]} : vector<2x128xf32> to vector<2x32xf32>
    %67 = vector.extract_strided_slice %64 {offsets = [0, 64], sizes = [2, 32], strides = [1, 1]} : vector<2x128xf32> to vector<2x32xf32>
    %68 = vector.extract_strided_slice %63 {offsets = [0, 96], sizes = [2, 32], strides = [1, 1]} : vector<2x128xf32> to vector<2x32xf32>
    %69 = arith.mulf %66, %49 : vector<2x32xf32>
    %70 = arith.mulf %65, %67 : vector<2x32xf32>
    %71 = arith.addf %69, %70 : vector<2x32xf32>
    %72 = math.tanh %71 : vector<2x32xf32>
    %73 = arith.mulf %68, %72 : vector<2x32xf32>
    %c4 = arith.constant 4 : index
    %c0_24 = arith.constant 0 : index
    %74 = vector.load %arg10[%c4, %c0_24] : memref<16x32xf32, #tpu.memory_space<vmem>>, vector<2x32xf32>
    tpu.vector_store %arg10[%c4, %c0_24], %73 {strides = array<i32>} : memref<16x32xf32, #tpu.memory_space<vmem>>, vector<2x32xf32>,
    %75 = vector.extract_strided_slice %5 {offsets = [6, 0], sizes = [2, 128], strides = [1, 1]} : vector<16x128xf32> to vector<2x128xf32>
    %76 = arith.truncf %73 : vector<2x32xf32> to vector<2x32xbf16>
    %cst_25 = arith.constant dense<0.000000e+00> : vector<2x128xf32>
    %77 = tpu.matmul %76, %6, %cst_25 {dimension_numbers = #tpu.dot_dimension_numbers<[1], [0], [0], [1], [0, 0, 1, 1], [], []>} : vector<2x32xbf16>, vector<32x128xbf16>, vector<2x128xf32> -> vector<2x128xf32>
    %78 = arith.addf %75, %77 : vector<2x128xf32>
    %cst_26 = arith.constant 5.000000e-01 : f32
    %79 = vector.broadcast %cst_26 : f32 to vector<2x128xf32>
    %80 = arith.mulf %79, %78 : vector<2x128xf32>
    %81 = math.tanh %80 : vector<2x128xf32>
    %cst_27 = arith.constant 1.000000e+00 : f32
    %82 = vector.broadcast %cst_27 : f32 to vector<2x128xf32>
    %83 = arith.addf %81, %82 : vector<2x128xf32>
    %cst_28 = arith.constant 5.000000e-01 : f32
    %84 = vector.broadcast %cst_28 : f32 to vector<2x128xf32>
    %85 = arith.mulf %84, %83 : vector<2x128xf32>
    %86 = math.tanh %78 : vector<2x128xf32>
    %87 = vector.extract_strided_slice %85 {offsets = [0, 0], sizes = [2, 32], strides = [1, 1]} : vector<2x128xf32> to vector<2x32xf32>
    %88 = vector.extract_strided_slice %85 {offsets = [0, 32], sizes = [2, 32], strides = [1, 1]} : vector<2x128xf32> to vector<2x32xf32>
    %89 = vector.extract_strided_slice %86 {offsets = [0, 64], sizes = [2, 32], strides = [1, 1]} : vector<2x128xf32> to vector<2x32xf32>
    %90 = vector.extract_strided_slice %85 {offsets = [0, 96], sizes = [2, 32], strides = [1, 1]} : vector<2x128xf32> to vector<2x32xf32>
    %91 = arith.mulf %88, %71 : vector<2x32xf32>
    %92 = arith.mulf %87, %89 : vector<2x32xf32>
    %93 = arith.addf %91, %92 : vector<2x32xf32>
    %94 = math.tanh %93 : vector<2x32xf32>
    %95 = arith.mulf %90, %94 : vector<2x32xf32>
    %c6 = arith.constant 6 : index
    %c0_29 = arith.constant 0 : index
    %96 = vector.load %arg10[%c6, %c0_29] : memref<16x32xf32, #tpu.memory_space<vmem>>, vector<2x32xf32>
    tpu.vector_store %arg10[%c6, %c0_29], %95 {strides = array<i32>} : memref<16x32xf32, #tpu.memory_space<vmem>>, vector<2x32xf32>,
    %97 = vector.extract_strided_slice %5 {offsets = [8, 0], sizes = [2, 128], strides = [1, 1]} : vector<16x128xf32> to vector<2x128xf32>
    %98 = arith.truncf %95 : vector<2x32xf32> to vector<2x32xbf16>
    %cst_30 = arith.constant dense<0.000000e+00> : vector<2x128xf32>
    %99 = tpu.matmul %98, %6, %cst_30 {dimension_numbers = #tpu.dot_dimension_numbers<[1], [0], [0], [1], [0, 0, 1, 1], [], []>} : vector<2x32xbf16>, vector<32x128xbf16>, vector<2x128xf32> -> vector<2x128xf32>
    %100 = arith.addf %97, %99 : vector<2x128xf32>
    %cst_31 = arith.constant 5.000000e-01 : f32
    %101 = vector.broadcast %cst_31 : f32 to vector<2x128xf32>
    %102 = arith.mulf %101, %100 : vector<2x128xf32>
    %103 = math.tanh %102 : vector<2x128xf32>
    %cst_32 = arith.constant 1.000000e+00 : f32
    %104 = vector.broadcast %cst_32 : f32 to vector<2x128xf32>
    %105 = arith.addf %103, %104 : vector<2x128xf32>
    %cst_33 = arith.constant 5.000000e-01 : f32
    %106 = vector.broadcast %cst_33 : f32 to vector<2x128xf32>
    %107 = arith.mulf %106, %105 : vector<2x128xf32>
    %108 = math.tanh %100 : vector<2x128xf32>
    %109 = vector.extract_strided_slice %107 {offsets = [0, 0], sizes = [2, 32], strides = [1, 1]} : vector<2x128xf32> to vector<2x32xf32>
    %110 = vector.extract_strided_slice %107 {offsets = [0, 32], sizes = [2, 32], strides = [1, 1]} : vector<2x128xf32> to vector<2x32xf32>
    %111 = vector.extract_strided_slice %108 {offsets = [0, 64], sizes = [2, 32], strides = [1, 1]} : vector<2x128xf32> to vector<2x32xf32>
    %112 = vector.extract_strided_slice %107 {offsets = [0, 96], sizes = [2, 32], strides = [1, 1]} : vector<2x128xf32> to vector<2x32xf32>
    %113 = arith.mulf %110, %93 : vector<2x32xf32>
    %114 = arith.mulf %109, %111 : vector<2x32xf32>
    %115 = arith.addf %113, %114 : vector<2x32xf32>
    %116 = math.tanh %115 : vector<2x32xf32>
    %117 = arith.mulf %112, %116 : vector<2x32xf32>
    %c8 = arith.constant 8 : index
    %c0_34 = arith.constant 0 : index
    %118 = vector.load %arg10[%c8, %c0_34] : memref<16x32xf32, #tpu.memory_space<vmem>>, vector<2x32xf32>
    tpu.vector_store %arg10[%c8, %c0_34], %117 {strides = array<i32>} : memref<16x32xf32, #tpu.memory_space<vmem>>, vector<2x32xf32>,
    %119 = vector.extract_strided_slice %5 {offsets = [10, 0], sizes = [2, 128], strides = [1, 1]} : vector<16x128xf32> to vector<2x128xf32>
    %120 = arith.truncf %117 : vector<2x32xf32> to vector<2x32xbf16>
    %cst_35 = arith.constant dense<0.000000e+00> : vector<2x128xf32>
    %121 = tpu.matmul %120, %6, %cst_35 {dimension_numbers = #tpu.dot_dimension_numbers<[1], [0], [0], [1], [0, 0, 1, 1], [], []>} : vector<2x32xbf16>, vector<32x128xbf16>, vector<2x128xf32> -> vector<2x128xf32>
    %122 = arith.addf %119, %121 : vector<2x128xf32>
    %cst_36 = arith.constant 5.000000e-01 : f32
    %123 = vector.broadcast %cst_36 : f32 to vector<2x128xf32>
    %124 = arith.mulf %123, %122 : vector<2x128xf32>
    %125 = math.tanh %124 : vector<2x128xf32>
    %cst_37 = arith.constant 1.000000e+00 : f32
    %126 = vector.broadcast %cst_37 : f32 to vector<2x128xf32>
    %127 = arith.addf %125, %126 : vector<2x128xf32>
    %cst_38 = arith.constant 5.000000e-01 : f32
    %128 = vector.broadcast %cst_38 : f32 to vector<2x128xf32>
    %129 = arith.mulf %128, %127 : vector<2x128xf32>
    %130 = math.tanh %122 : vector<2x128xf32>
    %131 = vector.extract_strided_slice %129 {offsets = [0, 0], sizes = [2, 32], strides = [1, 1]} : vector<2x128xf32> to vector<2x32xf32>
    %132 = vector.extract_strided_slice %129 {offsets = [0, 32], sizes = [2, 32], strides = [1, 1]} : vector<2x128xf32> to vector<2x32xf32>
    %133 = vector.extract_strided_slice %130 {offsets = [0, 64], sizes = [2, 32], strides = [1, 1]} : vector<2x128xf32> to vector<2x32xf32>
    %134 = vector.extract_strided_slice %129 {offsets = [0, 96], sizes = [2, 32], strides = [1, 1]} : vector<2x128xf32> to vector<2x32xf32>
    %135 = arith.mulf %132, %115 : vector<2x32xf32>
    %136 = arith.mulf %131, %133 : vector<2x32xf32>
    %137 = arith.addf %135, %136 : vector<2x32xf32>
    %138 = math.tanh %137 : vector<2x32xf32>
    %139 = arith.mulf %134, %138 : vector<2x32xf32>
    %c10 = arith.constant 10 : index
    %c0_39 = arith.constant 0 : index
    %140 = vector.load %arg10[%c10, %c0_39] : memref<16x32xf32, #tpu.memory_space<vmem>>, vector<2x32xf32>
    tpu.vector_store %arg10[%c10, %c0_39], %139 {strides = array<i32>} : memref<16x32xf32, #tpu.memory_space<vmem>>, vector<2x32xf32>,
    %141 = vector.extract_strided_slice %5 {offsets = [12, 0], sizes = [2, 128], strides = [1, 1]} : vector<16x128xf32> to vector<2x128xf32>
    %142 = arith.truncf %139 : vector<2x32xf32> to vector<2x32xbf16>
    %cst_40 = arith.constant dense<0.000000e+00> : vector<2x128xf32>
    %143 = tpu.matmul %142, %6, %cst_40 {dimension_numbers = #tpu.dot_dimension_numbers<[1], [0], [0], [1], [0, 0, 1, 1], [], []>} : vector<2x32xbf16>, vector<32x128xbf16>, vector<2x128xf32> -> vector<2x128xf32>
    %144 = arith.addf %141, %143 : vector<2x128xf32>
    %cst_41 = arith.constant 5.000000e-01 : f32
    %145 = vector.broadcast %cst_41 : f32 to vector<2x128xf32>
    %146 = arith.mulf %145, %144 : vector<2x128xf32>
    %147 = math.tanh %146 : vector<2x128xf32>
    %cst_42 = arith.constant 1.000000e+00 : f32
    %148 = vector.broadcast %cst_42 : f32 to vector<2x128xf32>
    %149 = arith.addf %147, %148 : vector<2x128xf32>
    %cst_43 = arith.constant 5.000000e-01 : f32
    %150 = vector.broadcast %cst_43 : f32 to vector<2x128xf32>
    %151 = arith.mulf %150, %149 : vector<2x128xf32>
    %152 = math.tanh %144 : vector<2x128xf32>
    %153 = vector.extract_strided_slice %151 {offsets = [0, 0], sizes = [2, 32], strides = [1, 1]} : vector<2x128xf32> to vector<2x32xf32>
    %154 = vector.extract_strided_slice %151 {offsets = [0, 32], sizes = [2, 32], strides = [1, 1]} : vector<2x128xf32> to vector<2x32xf32>
    %155 = vector.extract_strided_slice %152 {offsets = [0, 64], sizes = [2, 32], strides = [1, 1]} : vector<2x128xf32> to vector<2x32xf32>
    %156 = vector.extract_strided_slice %151 {offsets = [0, 96], sizes = [2, 32], strides = [1, 1]} : vector<2x128xf32> to vector<2x32xf32>
    %157 = arith.mulf %154, %137 : vector<2x32xf32>
    %158 = arith.mulf %153, %155 : vector<2x32xf32>
    %159 = arith.addf %157, %158 : vector<2x32xf32>
    %160 = math.tanh %159 : vector<2x32xf32>
    %161 = arith.mulf %156, %160 : vector<2x32xf32>
    %c12 = arith.constant 12 : index
    %c0_44 = arith.constant 0 : index
    %162 = vector.load %arg10[%c12, %c0_44] : memref<16x32xf32, #tpu.memory_space<vmem>>, vector<2x32xf32>
    tpu.vector_store %arg10[%c12, %c0_44], %161 {strides = array<i32>} : memref<16x32xf32, #tpu.memory_space<vmem>>, vector<2x32xf32>,
    %163 = vector.extract_strided_slice %5 {offsets = [14, 0], sizes = [2, 128], strides = [1, 1]} : vector<16x128xf32> to vector<2x128xf32>
    %164 = arith.truncf %161 : vector<2x32xf32> to vector<2x32xbf16>
    %cst_45 = arith.constant dense<0.000000e+00> : vector<2x128xf32>
    %165 = tpu.matmul %164, %6, %cst_45 {dimension_numbers = #tpu.dot_dimension_numbers<[1], [0], [0], [1], [0, 0, 1, 1], [], []>} : vector<2x32xbf16>, vector<32x128xbf16>, vector<2x128xf32> -> vector<2x128xf32>
    %166 = arith.addf %163, %165 : vector<2x128xf32>
    %cst_46 = arith.constant 5.000000e-01 : f32
    %167 = vector.broadcast %cst_46 : f32 to vector<2x128xf32>
    %168 = arith.mulf %167, %166 : vector<2x128xf32>
    %169 = math.tanh %168 : vector<2x128xf32>
    %cst_47 = arith.constant 1.000000e+00 : f32
    %170 = vector.broadcast %cst_47 : f32 to vector<2x128xf32>
    %171 = arith.addf %169, %170 : vector<2x128xf32>
    %cst_48 = arith.constant 5.000000e-01 : f32
    %172 = vector.broadcast %cst_48 : f32 to vector<2x128xf32>
    %173 = arith.mulf %172, %171 : vector<2x128xf32>
    %174 = math.tanh %166 : vector<2x128xf32>
    %175 = vector.extract_strided_slice %173 {offsets = [0, 0], sizes = [2, 32], strides = [1, 1]} : vector<2x128xf32> to vector<2x32xf32>
    %176 = vector.extract_strided_slice %173 {offsets = [0, 32], sizes = [2, 32], strides = [1, 1]} : vector<2x128xf32> to vector<2x32xf32>
    %177 = vector.extract_strided_slice %174 {offsets = [0, 64], sizes = [2, 32], strides = [1, 1]} : vector<2x128xf32> to vector<2x32xf32>
    %178 = vector.extract_strided_slice %173 {offsets = [0, 96], sizes = [2, 32], strides = [1, 1]} : vector<2x128xf32> to vector<2x32xf32>
    %179 = arith.mulf %176, %159 : vector<2x32xf32>
    %180 = arith.mulf %175, %177 : vector<2x32xf32>
    %181 = arith.addf %179, %180 : vector<2x32xf32>
    %182 = math.tanh %181 : vector<2x32xf32>
    %183 = arith.mulf %178, %182 : vector<2x32xf32>
    %c14 = arith.constant 14 : index
    %c0_49 = arith.constant 0 : index
    %184 = vector.load %arg10[%c14, %c0_49] : memref<16x32xf32, #tpu.memory_space<vmem>>, vector<2x32xf32>
    tpu.vector_store %arg10[%c14, %c0_49], %183 {strides = array<i32>} : memref<16x32xf32, #tpu.memory_space<vmem>>, vector<2x32xf32>,
    %c0_50 = arith.constant 0 : index
    %c0_51 = arith.constant 0 : index
    %185 = vector.load %arg10[%c0_50, %c0_51] : memref<16x32xf32, #tpu.memory_space<vmem>>, vector<16x32xf32>
    %186 = arith.truncf %185 : vector<16x32xf32> to vector<16x32xbf16>
    %c0_52 = arith.constant 0 : index
    %c0_53 = arith.constant 0 : index
    %187 = vector.load %arg4[%c0_52, %c0_53] : memref<32x128xbf16, #tpu.memory_space<vmem>>, vector<32x128xbf16>
    %cst_54 = arith.constant dense<0.000000e+00> : vector<16x128xf32>
    %188 = tpu.matmul %186, %187, %cst_54 {dimension_numbers = #tpu.dot_dimension_numbers<[1], [0], [0], [1], [0, 0, 1, 1], [], []>} : vector<16x32xbf16>, vector<32x128xbf16>, vector<16x128xf32> -> vector<16x128xf32>
    %c0_55 = arith.constant 0 : index
    %c0_56 = arith.constant 0 : index
    %189 = vector.load %arg6[%c0_55, %c0_56] : memref<1x128xf32, #tpu.memory_space<vmem>>, vector<1x128xf32>
    %190 = vector.broadcast %189 : vector<1x128xf32> to vector<16x128xf32>
    %191 = arith.addf %188, %190 : vector<16x128xf32>
    %c0_57 = arith.constant 0 : index
    %c0_58 = arith.constant 0 : index
    %192 = vector.load %arg5[%c0_57, %c0_58] : memref<32x128xbf16, #tpu.memory_space<vmem>>, vector<32x128xbf16>
    %cst_59 = arith.constant 0.000000e+00 : f32
    %193 = vector.broadcast %cst_59 : f32 to vector<2x32xf32>
    %cst_60 = arith.constant 0.000000e+00 : f32
    %194 = vector.broadcast %cst_60 : f32 to vector<2x32xf32>
    %195 = vector.extract_strided_slice %191 {offsets = [0, 0], sizes = [2, 128], strides = [1, 1]} : vector<16x128xf32> to vector<2x128xf32>
    %196 = arith.truncf %193 : vector<2x32xf32> to vector<2x32xbf16>
    %cst_61 = arith.constant dense<0.000000e+00> : vector<2x128xf32>
    %197 = tpu.matmul %196, %192, %cst_61 {dimension_numbers = #tpu.dot_dimension_numbers<[1], [0], [0], [1], [0, 0, 1, 1], [], []>} : vector<2x32xbf16>, vector<32x128xbf16>, vector<2x128xf32> -> vector<2x128xf32>
    %198 = arith.addf %195, %197 : vector<2x128xf32>
    %cst_62 = arith.constant 5.000000e-01 : f32
    %199 = vector.broadcast %cst_62 : f32 to vector<2x128xf32>
    %200 = arith.mulf %199, %198 : vector<2x128xf32>
    %201 = math.tanh %200 : vector<2x128xf32>
    %cst_63 = arith.constant 1.000000e+00 : f32
    %202 = vector.broadcast %cst_63 : f32 to vector<2x128xf32>
    %203 = arith.addf %201, %202 : vector<2x128xf32>
    %cst_64 = arith.constant 5.000000e-01 : f32
    %204 = vector.broadcast %cst_64 : f32 to vector<2x128xf32>
    %205 = arith.mulf %204, %203 : vector<2x128xf32>
    %206 = math.tanh %198 : vector<2x128xf32>
    %207 = vector.extract_strided_slice %205 {offsets = [0, 0], sizes = [2, 32], strides = [1, 1]} : vector<2x128xf32> to vector<2x32xf32>
    %208 = vector.extract_strided_slice %205 {offsets = [0, 32], sizes = [2, 32], strides = [1, 1]} : vector<2x128xf32> to vector<2x32xf32>
    %209 = vector.extract_strided_slice %206 {offsets = [0, 64], sizes = [2, 32], strides = [1, 1]} : vector<2x128xf32> to vector<2x32xf32>
    %210 = vector.extract_strided_slice %205 {offsets = [0, 96], sizes = [2, 32], strides = [1, 1]} : vector<2x128xf32> to vector<2x32xf32>
    %211 = arith.mulf %208, %194 : vector<2x32xf32>
    %212 = arith.mulf %207, %209 : vector<2x32xf32>
    %213 = arith.addf %211, %212 : vector<2x32xf32>
    %214 = math.tanh %213 : vector<2x32xf32>
    %215 = arith.mulf %210, %214 : vector<2x32xf32>
    %216 = vector.extract_strided_slice %191 {offsets = [2, 0], sizes = [2, 128], strides = [1, 1]} : vector<16x128xf32> to vector<2x128xf32>
    %217 = arith.truncf %215 : vector<2x32xf32> to vector<2x32xbf16>
    %cst_65 = arith.constant dense<0.000000e+00> : vector<2x128xf32>
    %218 = tpu.matmul %217, %192, %cst_65 {dimension_numbers = #tpu.dot_dimension_numbers<[1], [0], [0], [1], [0, 0, 1, 1], [], []>} : vector<2x32xbf16>, vector<32x128xbf16>, vector<2x128xf32> -> vector<2x128xf32>
    %219 = arith.addf %216, %218 : vector<2x128xf32>
    %cst_66 = arith.constant 5.000000e-01 : f32
    %220 = vector.broadcast %cst_66 : f32 to vector<2x128xf32>
    %221 = arith.mulf %220, %219 : vector<2x128xf32>
    %222 = math.tanh %221 : vector<2x128xf32>
    %cst_67 = arith.constant 1.000000e+00 : f32
    %223 = vector.broadcast %cst_67 : f32 to vector<2x128xf32>
    %224 = arith.addf %222, %223 : vector<2x128xf32>
    %cst_68 = arith.constant 5.000000e-01 : f32
    %225 = vector.broadcast %cst_68 : f32 to vector<2x128xf32>
    %226 = arith.mulf %225, %224 : vector<2x128xf32>
    %227 = math.tanh %219 : vector<2x128xf32>
    %228 = vector.extract_strided_slice %226 {offsets = [0, 0], sizes = [2, 32], strides = [1, 1]} : vector<2x128xf32> to vector<2x32xf32>
    %229 = vector.extract_strided_slice %226 {offsets = [0, 32], sizes = [2, 32], strides = [1, 1]} : vector<2x128xf32> to vector<2x32xf32>
    %230 = vector.extract_strided_slice %227 {offsets = [0, 64], sizes = [2, 32], strides = [1, 1]} : vector<2x128xf32> to vector<2x32xf32>
    %231 = vector.extract_strided_slice %226 {offsets = [0, 96], sizes = [2, 32], strides = [1, 1]} : vector<2x128xf32> to vector<2x32xf32>
    %232 = arith.mulf %229, %213 : vector<2x32xf32>
    %233 = arith.mulf %228, %230 : vector<2x32xf32>
    %234 = arith.addf %232, %233 : vector<2x32xf32>
    %235 = math.tanh %234 : vector<2x32xf32>
    %236 = arith.mulf %231, %235 : vector<2x32xf32>
    %237 = vector.extract_strided_slice %191 {offsets = [4, 0], sizes = [2, 128], strides = [1, 1]} : vector<16x128xf32> to vector<2x128xf32>
    %238 = arith.truncf %236 : vector<2x32xf32> to vector<2x32xbf16>
    %cst_69 = arith.constant dense<0.000000e+00> : vector<2x128xf32>
    %239 = tpu.matmul %238, %192, %cst_69 {dimension_numbers = #tpu.dot_dimension_numbers<[1], [0], [0], [1], [0, 0, 1, 1], [], []>} : vector<2x32xbf16>, vector<32x128xbf16>, vector<2x128xf32> -> vector<2x128xf32>
    %240 = arith.addf %237, %239 : vector<2x128xf32>
    %cst_70 = arith.constant 5.000000e-01 : f32
    %241 = vector.broadcast %cst_70 : f32 to vector<2x128xf32>
    %242 = arith.mulf %241, %240 : vector<2x128xf32>
    %243 = math.tanh %242 : vector<2x128xf32>
    %cst_71 = arith.constant 1.000000e+00 : f32
    %244 = vector.broadcast %cst_71 : f32 to vector<2x128xf32>
    %245 = arith.addf %243, %244 : vector<2x128xf32>
    %cst_72 = arith.constant 5.000000e-01 : f32
    %246 = vector.broadcast %cst_72 : f32 to vector<2x128xf32>
    %247 = arith.mulf %246, %245 : vector<2x128xf32>
    %248 = math.tanh %240 : vector<2x128xf32>
    %249 = vector.extract_strided_slice %247 {offsets = [0, 0], sizes = [2, 32], strides = [1, 1]} : vector<2x128xf32> to vector<2x32xf32>
    %250 = vector.extract_strided_slice %247 {offsets = [0, 32], sizes = [2, 32], strides = [1, 1]} : vector<2x128xf32> to vector<2x32xf32>
    %251 = vector.extract_strided_slice %248 {offsets = [0, 64], sizes = [2, 32], strides = [1, 1]} : vector<2x128xf32> to vector<2x32xf32>
    %252 = vector.extract_strided_slice %247 {offsets = [0, 96], sizes = [2, 32], strides = [1, 1]} : vector<2x128xf32> to vector<2x32xf32>
    %253 = arith.mulf %250, %234 : vector<2x32xf32>
    %254 = arith.mulf %249, %251 : vector<2x32xf32>
    %255 = arith.addf %253, %254 : vector<2x32xf32>
    %256 = math.tanh %255 : vector<2x32xf32>
    %257 = arith.mulf %252, %256 : vector<2x32xf32>
    %258 = vector.extract_strided_slice %191 {offsets = [6, 0], sizes = [2, 128], strides = [1, 1]} : vector<16x128xf32> to vector<2x128xf32>
    %259 = arith.truncf %257 : vector<2x32xf32> to vector<2x32xbf16>
    %cst_73 = arith.constant dense<0.000000e+00> : vector<2x128xf32>
    %260 = tpu.matmul %259, %192, %cst_73 {dimension_numbers = #tpu.dot_dimension_numbers<[1], [0], [0], [1], [0, 0, 1, 1], [], []>} : vector<2x32xbf16>, vector<32x128xbf16>, vector<2x128xf32> -> vector<2x128xf32>
    %261 = arith.addf %258, %260 : vector<2x128xf32>
    %cst_74 = arith.constant 5.000000e-01 : f32
    %262 = vector.broadcast %cst_74 : f32 to vector<2x128xf32>
    %263 = arith.mulf %262, %261 : vector<2x128xf32>
    %264 = math.tanh %263 : vector<2x128xf32>
    %cst_75 = arith.constant 1.000000e+00 : f32
    %265 = vector.broadcast %cst_75 : f32 to vector<2x128xf32>
    %266 = arith.addf %264, %265 : vector<2x128xf32>
    %cst_76 = arith.constant 5.000000e-01 : f32
    %267 = vector.broadcast %cst_76 : f32 to vector<2x128xf32>
    %268 = arith.mulf %267, %266 : vector<2x128xf32>
    %269 = math.tanh %261 : vector<2x128xf32>
    %270 = vector.extract_strided_slice %268 {offsets = [0, 0], sizes = [2, 32], strides = [1, 1]} : vector<2x128xf32> to vector<2x32xf32>
    %271 = vector.extract_strided_slice %268 {offsets = [0, 32], sizes = [2, 32], strides = [1, 1]} : vector<2x128xf32> to vector<2x32xf32>
    %272 = vector.extract_strided_slice %269 {offsets = [0, 64], sizes = [2, 32], strides = [1, 1]} : vector<2x128xf32> to vector<2x32xf32>
    %273 = vector.extract_strided_slice %268 {offsets = [0, 96], sizes = [2, 32], strides = [1, 1]} : vector<2x128xf32> to vector<2x32xf32>
    %274 = arith.mulf %271, %255 : vector<2x32xf32>
    %275 = arith.mulf %270, %272 : vector<2x32xf32>
    %276 = arith.addf %274, %275 : vector<2x32xf32>
    %277 = math.tanh %276 : vector<2x32xf32>
    %278 = arith.mulf %273, %277 : vector<2x32xf32>
    %279 = vector.extract_strided_slice %191 {offsets = [8, 0], sizes = [2, 128], strides = [1, 1]} : vector<16x128xf32> to vector<2x128xf32>
    %280 = arith.truncf %278 : vector<2x32xf32> to vector<2x32xbf16>
    %cst_77 = arith.constant dense<0.000000e+00> : vector<2x128xf32>
    %281 = tpu.matmul %280, %192, %cst_77 {dimension_numbers = #tpu.dot_dimension_numbers<[1], [0], [0], [1], [0, 0, 1, 1], [], []>} : vector<2x32xbf16>, vector<32x128xbf16>, vector<2x128xf32> -> vector<2x128xf32>
    %282 = arith.addf %279, %281 : vector<2x128xf32>
    %cst_78 = arith.constant 5.000000e-01 : f32
    %283 = vector.broadcast %cst_78 : f32 to vector<2x128xf32>
    %284 = arith.mulf %283, %282 : vector<2x128xf32>
    %285 = math.tanh %284 : vector<2x128xf32>
    %cst_79 = arith.constant 1.000000e+00 : f32
    %286 = vector.broadcast %cst_79 : f32 to vector<2x128xf32>
    %287 = arith.addf %285, %286 : vector<2x128xf32>
    %cst_80 = arith.constant 5.000000e-01 : f32
    %288 = vector.broadcast %cst_80 : f32 to vector<2x128xf32>
    %289 = arith.mulf %288, %287 : vector<2x128xf32>
    %290 = math.tanh %282 : vector<2x128xf32>
    %291 = vector.extract_strided_slice %289 {offsets = [0, 0], sizes = [2, 32], strides = [1, 1]} : vector<2x128xf32> to vector<2x32xf32>
    %292 = vector.extract_strided_slice %289 {offsets = [0, 32], sizes = [2, 32], strides = [1, 1]} : vector<2x128xf32> to vector<2x32xf32>
    %293 = vector.extract_strided_slice %290 {offsets = [0, 64], sizes = [2, 32], strides = [1, 1]} : vector<2x128xf32> to vector<2x32xf32>
    %294 = vector.extract_strided_slice %289 {offsets = [0, 96], sizes = [2, 32], strides = [1, 1]} : vector<2x128xf32> to vector<2x32xf32>
    %295 = arith.mulf %292, %276 : vector<2x32xf32>
    %296 = arith.mulf %291, %293 : vector<2x32xf32>
    %297 = arith.addf %295, %296 : vector<2x32xf32>
    %298 = math.tanh %297 : vector<2x32xf32>
    %299 = arith.mulf %294, %298 : vector<2x32xf32>
    %300 = vector.extract_strided_slice %191 {offsets = [10, 0], sizes = [2, 128], strides = [1, 1]} : vector<16x128xf32> to vector<2x128xf32>
    %301 = arith.truncf %299 : vector<2x32xf32> to vector<2x32xbf16>
    %cst_81 = arith.constant dense<0.000000e+00> : vector<2x128xf32>
    %302 = tpu.matmul %301, %192, %cst_81 {dimension_numbers = #tpu.dot_dimension_numbers<[1], [0], [0], [1], [0, 0, 1, 1], [], []>} : vector<2x32xbf16>, vector<32x128xbf16>, vector<2x128xf32> -> vector<2x128xf32>
    %303 = arith.addf %300, %302 : vector<2x128xf32>
    %cst_82 = arith.constant 5.000000e-01 : f32
    %304 = vector.broadcast %cst_82 : f32 to vector<2x128xf32>
    %305 = arith.mulf %304, %303 : vector<2x128xf32>
    %306 = math.tanh %305 : vector<2x128xf32>
    %cst_83 = arith.constant 1.000000e+00 : f32
    %307 = vector.broadcast %cst_83 : f32 to vector<2x128xf32>
    %308 = arith.addf %306, %307 : vector<2x128xf32>
    %cst_84 = arith.constant 5.000000e-01 : f32
    %309 = vector.broadcast %cst_84 : f32 to vector<2x128xf32>
    %310 = arith.mulf %309, %308 : vector<2x128xf32>
    %311 = math.tanh %303 : vector<2x128xf32>
    %312 = vector.extract_strided_slice %310 {offsets = [0, 0], sizes = [2, 32], strides = [1, 1]} : vector<2x128xf32> to vector<2x32xf32>
    %313 = vector.extract_strided_slice %310 {offsets = [0, 32], sizes = [2, 32], strides = [1, 1]} : vector<2x128xf32> to vector<2x32xf32>
    %314 = vector.extract_strided_slice %311 {offsets = [0, 64], sizes = [2, 32], strides = [1, 1]} : vector<2x128xf32> to vector<2x32xf32>
    %315 = vector.extract_strided_slice %310 {offsets = [0, 96], sizes = [2, 32], strides = [1, 1]} : vector<2x128xf32> to vector<2x32xf32>
    %316 = arith.mulf %313, %297 : vector<2x32xf32>
    %317 = arith.mulf %312, %314 : vector<2x32xf32>
    %318 = arith.addf %316, %317 : vector<2x32xf32>
    %319 = math.tanh %318 : vector<2x32xf32>
    %320 = arith.mulf %315, %319 : vector<2x32xf32>
    %321 = vector.extract_strided_slice %191 {offsets = [12, 0], sizes = [2, 128], strides = [1, 1]} : vector<16x128xf32> to vector<2x128xf32>
    %322 = arith.truncf %320 : vector<2x32xf32> to vector<2x32xbf16>
    %cst_85 = arith.constant dense<0.000000e+00> : vector<2x128xf32>
    %323 = tpu.matmul %322, %192, %cst_85 {dimension_numbers = #tpu.dot_dimension_numbers<[1], [0], [0], [1], [0, 0, 1, 1], [], []>} : vector<2x32xbf16>, vector<32x128xbf16>, vector<2x128xf32> -> vector<2x128xf32>
    %324 = arith.addf %321, %323 : vector<2x128xf32>
    %cst_86 = arith.constant 5.000000e-01 : f32
    %325 = vector.broadcast %cst_86 : f32 to vector<2x128xf32>
    %326 = arith.mulf %325, %324 : vector<2x128xf32>
    %327 = math.tanh %326 : vector<2x128xf32>
    %cst_87 = arith.constant 1.000000e+00 : f32
    %328 = vector.broadcast %cst_87 : f32 to vector<2x128xf32>
    %329 = arith.addf %327, %328 : vector<2x128xf32>
    %cst_88 = arith.constant 5.000000e-01 : f32
    %330 = vector.broadcast %cst_88 : f32 to vector<2x128xf32>
    %331 = arith.mulf %330, %329 : vector<2x128xf32>
    %332 = math.tanh %324 : vector<2x128xf32>
    %333 = vector.extract_strided_slice %331 {offsets = [0, 0], sizes = [2, 32], strides = [1, 1]} : vector<2x128xf32> to vector<2x32xf32>
    %334 = vector.extract_strided_slice %331 {offsets = [0, 32], sizes = [2, 32], strides = [1, 1]} : vector<2x128xf32> to vector<2x32xf32>
    %335 = vector.extract_strided_slice %332 {offsets = [0, 64], sizes = [2, 32], strides = [1, 1]} : vector<2x128xf32> to vector<2x32xf32>
    %336 = vector.extract_strided_slice %331 {offsets = [0, 96], sizes = [2, 32], strides = [1, 1]} : vector<2x128xf32> to vector<2x32xf32>
    %337 = arith.mulf %334, %318 : vector<2x32xf32>
    %338 = arith.mulf %333, %335 : vector<2x32xf32>
    %339 = arith.addf %337, %338 : vector<2x32xf32>
    %340 = math.tanh %339 : vector<2x32xf32>
    %341 = arith.mulf %336, %340 : vector<2x32xf32>
    %342 = vector.extract_strided_slice %191 {offsets = [14, 0], sizes = [2, 128], strides = [1, 1]} : vector<16x128xf32> to vector<2x128xf32>
    %343 = arith.truncf %341 : vector<2x32xf32> to vector<2x32xbf16>
    %cst_89 = arith.constant dense<0.000000e+00> : vector<2x128xf32>
    %344 = tpu.matmul %343, %192, %cst_89 {dimension_numbers = #tpu.dot_dimension_numbers<[1], [0], [0], [1], [0, 0, 1, 1], [], []>} : vector<2x32xbf16>, vector<32x128xbf16>, vector<2x128xf32> -> vector<2x128xf32>
    %345 = arith.addf %342, %344 : vector<2x128xf32>
    %cst_90 = arith.constant 5.000000e-01 : f32
    %346 = vector.broadcast %cst_90 : f32 to vector<2x128xf32>
    %347 = arith.mulf %346, %345 : vector<2x128xf32>
    %348 = math.tanh %347 : vector<2x128xf32>
    %cst_91 = arith.constant 1.000000e+00 : f32
    %349 = vector.broadcast %cst_91 : f32 to vector<2x128xf32>
    %350 = arith.addf %348, %349 : vector<2x128xf32>
    %cst_92 = arith.constant 5.000000e-01 : f32
    %351 = vector.broadcast %cst_92 : f32 to vector<2x128xf32>
    %352 = arith.mulf %351, %350 : vector<2x128xf32>
    %353 = math.tanh %345 : vector<2x128xf32>
    %354 = vector.extract_strided_slice %352 {offsets = [0, 0], sizes = [2, 32], strides = [1, 1]} : vector<2x128xf32> to vector<2x32xf32>
    %355 = vector.extract_strided_slice %352 {offsets = [0, 32], sizes = [2, 32], strides = [1, 1]} : vector<2x128xf32> to vector<2x32xf32>
    %356 = vector.extract_strided_slice %353 {offsets = [0, 64], sizes = [2, 32], strides = [1, 1]} : vector<2x128xf32> to vector<2x32xf32>
    %357 = vector.extract_strided_slice %352 {offsets = [0, 96], sizes = [2, 32], strides = [1, 1]} : vector<2x128xf32> to vector<2x32xf32>
    %358 = arith.mulf %355, %339 : vector<2x32xf32>
    %359 = arith.mulf %354, %356 : vector<2x32xf32>
    %360 = arith.addf %358, %359 : vector<2x32xf32>
    %361 = math.tanh %360 : vector<2x32xf32>
    %362 = arith.mulf %357, %361 : vector<2x32xf32>
    %363 = arith.truncf %362 : vector<2x32xf32> to vector<2x32xbf16>
    %c0_93 = arith.constant 0 : index
    %c0_94 = arith.constant 0 : index
    %364 = vector.load %arg7[%c0_93, %c0_94] : memref<32x12xbf16, #tpu.memory_space<vmem>>, vector<32x12xbf16>
    %cst_95 = arith.constant dense<0.000000e+00> : vector<2x12xf32>
    %365 = tpu.matmul %363, %364, %cst_95 {dimension_numbers = #tpu.dot_dimension_numbers<[1], [0], [0], [1], [0, 0, 1, 1], [], []>} : vector<2x32xbf16>, vector<32x12xbf16>, vector<2x12xf32> -> vector<2x12xf32>
    %c0_96 = arith.constant 0 : index
    %c0_97 = arith.constant 0 : index
    %366 = vector.load %arg8[%c0_96, %c0_97] : memref<1x12xf32, #tpu.memory_space<vmem>>, vector<1x12xf32>
    %367 = vector.broadcast %366 : vector<1x12xf32> to vector<2x12xf32>
    %368 = arith.addf %365, %367 : vector<2x12xf32>
    %c0_98 = arith.constant 0 : index
    %c0_99 = arith.constant 0 : index
    %369 = vector.load %arg9[%c0_98, %c0_99] : memref<2x12xf32, #tpu.memory_space<vmem>>, vector<2x12xf32>
    tpu.vector_store %arg9[%c0_98, %c0_99], %368 {strides = array<i32>} : memref<2x12xf32, #tpu.memory_space<vmem>>, vector<2x12xf32>,
    return
  }
}

</mosaic_0001>

<bundles_post_ra>
// kernel: lstm_model_forward.1
= control target key start
LH: loop header
LB: loop body
LE: loop exit
PB: predicated region body
PF: predicated region fallthrough
CT: control target
= control target key end

     0   :  { %vm52_vm0 = vcmask 1041408   ;;  %v1863_v0 = vmov 0.0   ;;  %vm1864_vm1 = vmmov 0   ;;  %vm48_vm2 = vcmask 31744   ;;  %s1866_s16 = smov 64   ;;  %s2218_s1 = inlined_call_operand.vmem [shape: bf16[4,128], index: 1, kind: input, shape index: {}]   ;;  %s2219_s2 = inlined_call_operand.vmem [shape: bf16[32,128], index: 2, kind: input, shape index: {}]   ;;  %s2220_s0 = inlined_call_operand.vmem [shape: bf16[16,4], index: 0, kind: input, shape index: {}]   ;;  %s2221_s3 = inlined_call_operand.vmem [shape: f32[1,128], index: 3, kind: input, shape index: {}]   ;;  %s2222_s5 = inlined_call_operand.vmem [shape: bf16[32,128], index: 5, kind: input, shape index: {}]   ;;  %s2223_s4 = inlined_call_operand.vmem [shape: bf16[32,128], index: 4, kind: input, shape index: {}]   ;;  %s2224_s6 = inlined_call_operand.vmem [shape: f32[1,128], index: 6, kind: input, shape index: {}]   ;;  %s2225_s7 = inlined_call_operand.vmem [shape: bf16[32,12], index: 7, kind: input, shape index: {}]   ;;  %s2226_s8 = inlined_call_operand.vmem [shape: f32[1,12], index: 8, kind: input, shape index: {}]   ;;  %s2227_s9 = inlined_call_operand.vmem [shape: f32[2,12], index: 9, kind: output, shape index: {}]  }
   0x1   :  { %1603 = vmatprep.subr.bf16.mxu0 %v1863_v0  ;;  %v35_v1 = vld [vmem:[%s2218_s1] sm:$0x3]  ;;  %1609 = vmatprep.subr.bf16.mxu1 %v1863_v0  ;;  %v1926_v3 = vld [vmem:[%s2219_s2 + $0x8] sm:$0xff]   ;;  %v1865_v6 = vmov 0   ;;  %vm113_vm3 = vcmask 261120   ;;  %vm184_vm4 = vcmask 254976  }
   0x2   :  { %v54_v2 = vsel %vm52_vm0, %v35_v1, 0  ;;  %1605 = vmatprep.mubr.msk.bf16.mxu0 %vm1864_vm1, %v1863_v0  ;;  %1613 = vmatprep.mubr.msk.bf16.mxu1 %vm1864_vm1, %v1863_v0  ;;  %v1759_v4 = vld [vmem:[%s2220_s0] sm:$0xff]   ;;  %vm349_vm5 = vcmask 259076   ;;  %vm266_vm6 = vcmask 257026   ;;  %vm432_vm7 = vcmask 261126  }
   0x3   :  { %1604 = vmatpush3.bf16.msra.mxu0 %v54_v2  ;;  %1610 = vmatpush3.bf16.msra.mxu1 %v1926_v3  ;;  %v1939_v5 = vld [vmem:[%s2219_s2] sm:$0xff]   ;;  %vm1512_vm8 = vcmask 91136  }
   0x4   :  { %1617 = vmatprep.subr.bf16.mxu0 %v1863_v0  ;;  %1611 = vmatprep.subr.bf16.mxu1 %v1863_v0  ;;  %v1518_v7 = vld [vmem:[%s2221_s3] ss:$0 sm:$0xff]  ;;  %s1867_s3 = smov 32  }
   0x6   :  { %1606 = vmatmul.mubr.msk.bf16.vlgmr.msra.gmra.mxu0 %vm48_vm2, %v1759_v4 }
   0x7   :  { %1618 = vmatpush3.bf16.msra.mxu0 %v1926_v3  ;;  %1621 = vmatprep.mubr.msk.bf16.mxu0 %vm1864_vm1, %v1863_v0 }
   0x8   :  { %1612 = vmatpush3.bf16.msra.mxu1 %v1939_v5  ;;  %1619 = vmatprep.subr.bf16.mxu0 %v1863_v0 }
   0x9   :  { %1625 = vmatprep.subr.bf16.mxu1 %v1863_v0 }
   0xb   :  { %1614 = vmatmul.mubr.bf16.vlgmr.msra.gmra.mxu1 %v1865_v6  ;;  %1620 = vmatpush3.bf16.msra.mxu0 %v1939_v5 }
   0xc   :  { %1626 = vmatpush3.bf16.msra.mxu1 %v1926_v3  ;;  %1629 = vmatprep.mubr.msk.bf16.mxu1 %vm1864_vm1, %v1863_v0 }
   0xd   :  { %1627 = vmatprep.subr.bf16.mxu1 %v1863_v0  ;;  %1633 = vmatprep.subr.bf16.mxu0 %v1863_v0 }
  0x10   :  { %1628 = vmatpush3.bf16.msra.mxu1 %v1939_v5 }
  0x11   :  { %1641 = vmatprep.subr.bf16.mxu1 %v1863_v0 }
  0xc6   :  { %v90_v8 = vpop.f32.mrf.mxu0 }
  0xc7   :  { %v1961_v9 = vadd.f32 %v1518_v7, %v90_v8 }
  0xc8   :  { %v1607_v10 = vpop.f32.mrf.mxu0 }
  0xca   :  { %v93_v11 = vpop.f32.mrf.mxu0 }
  0xcb   :  { %v1963_v12 = vadd.f32 %v1518_v7, %v93_v11  ;;  %v151_v13 = vpop.f32.mrf.mxu1 }
  0xcc   :  { %v157_v14 = vadd.f32 %v151_v13, %v1961_v9  ;;  %v1608_v15 = vpop.f32.mrf.mxu0 }
  0xcd   :  { %v1615_v16 = vpop.f32.mrf.mxu1 }
  0xce   :  { %1767 = vtanh.f32 %v157_v14  ;;  %v158_v20 = vmul.f32 0.5, %v157_v14 }
  0xcf   :  { %v154_v17 = vpop.f32.mrf.mxu1 }
  0xd0   :  { %1769 = vtanh.f32 %v158_v20 }
  0xd1   :  { %v1616_v18 = vpop.f32.mrf.mxu1 }
  0xdb   :  { %v1768_v19 = vpop.eup %1767 }
  0xdc   :  { %165 = vrot.lane.b32.xlu0 %v1768_v19, %s1866_s16 }
  0xdd   :  { %v1770_v21 = vpop.eup %1769 }
  0xde   :  { %v160_v22 = vadd.f32 1.0, %v1770_v21 }
  0xe0   :  { %v161_v23 = vmul.f32 0.5, %v160_v22 }
  0xe2   :  { %v163_v26 = vmul.f32 0.0, %v161_v23 }
 0x14e   :  { %v166_v24 = vpop.permute.xlu0 %165 }
 0x14f   :  { %v168_v25 = vmul.f32 %v166_v24, %v161_v23 }
 0x151   :  { %170 = vrot.lane.b32.xlu0 %v168_v25, %s1867_s3 }
 0x1c3   :  { %v171_v27 = vpop.permute.xlu0 %170 }
 0x1c4   :  { %v173_v28 = vadd.f32 %v171_v27, %v163_v26 }
 0x1c6   :  { %1771 = vtanh.f32 %v173_v28  ;;  %v243_v47 = vrot.slane %v173_v28, 6 }
 0x1d3   :  { %v1772_v29 = vpop.eup %1771 }
 0x1d4   :  { %176 = vrot.lane.b32.xlu1 %v1772_v29, %s1866_s16 }
 0x246   :  { %v177_v30 = vpop.permute.xlu1 %176 }
 0x247   :  { %v1969_v31 = vmul.f32 %v177_v30, %v161_v23 }
 0x249   :  { %v186_v32 = vpack.c.bf16 %v1969_v31, %v1969_v31 }
 0x24b   :  { %188 = vrot.lane.b32.xlu1 %v186_v32, %s1867_s3 }
 0x2bd   :  { %v189_v33 = vpop.permute.xlu1 %188 }
 0x2be   :  { %1622 = vmatmul.mubr.msk.bf16.vlgmr.msra.gmra.mxu0 %vm113_vm3, %v189_v33 }
 0x2bf   :  { %1634 = vmatpush3.bf16.msra.mxu0 %v1926_v3  ;;  %1637 = vmatprep.mubr.msk.bf16.mxu0 %vm1864_vm1, %v1863_v0 }
 0x2c0   :  { %1635 = vmatprep.subr.bf16.mxu0 %v1863_v0 }
 0x2c3   :  { %1636 = vmatpush3.bf16.msra.mxu0 %v1939_v5 }
 0x2c4   :  { %1649 = vmatprep.subr.bf16.mxu0 %v1863_v0 }
 0x37e   :  { %v227_v34 = vpop.f32.mrf.mxu0 }
 0x37f   :  { %v234_v35 = vrot.slane %v227_v34, 6 }
 0x380   :  { %v1623_v36 = vpop.f32.mrf.mxu0 }
 0x381   :  { %v236_v37 = vadd.f32 %v234_v35, %v1961_v9 }
 0x382   :  { %v230_v38 = vpop.f32.mrf.mxu0 }
 0x383   :  { %1773 = vtanh.f32 %v236_v37  ;;  %v237_v41 = vmul.f32 0.5, %v236_v37 }
 0x384   :  { %v1624_v39 = vpop.f32.mrf.mxu0 }
 0x385   :  { %1775 = vtanh.f32 %v237_v41 }
 0x390   :  { %v1774_v40 = vpop.eup %1773 }
 0x391   :  { %247 = vrot.lane.b32.xlu0 %v1774_v40, %s1866_s16 }
 0x392   :  { %v1776_v42 = vpop.eup %1775 }
 0x393   :  { %v239_v43 = vadd.f32 1.0, %v1776_v42 }
 0x395   :  { %v240_v44 = vmul.f32 0.5, %v239_v43 }
 0x397   :  { %v245_v48 = vmul.f32 %v243_v47, %v240_v44 }
 0x403   :  { %v248_v45 = vpop.permute.xlu0 %247 }
 0x404   :  { %v250_v46 = vmul.f32 %v248_v45, %v240_v44 }
 0x406   :  { %252 = vrot.lane.b32.xlu1 %v250_v46, %s1867_s3 }
 0x478   :  { %v253_v49 = vpop.permute.xlu1 %252 }
 0x479   :  { %v255_v50 = vadd.f32 %v253_v49, %v245_v48 }
 0x47b   :  { %1777 = vtanh.f32 %v255_v50  ;;  %v326_v11 = vrot.slane %v255_v50, 6 }
 0x488   :  { %v1778_v51 = vpop.eup %1777 }
 0x489   :  { %258 = vrot.lane.b32.xlu0 %v1778_v51, %s1866_s16 }
 0x4fb   :  { %v259_v52 = vpop.permute.xlu0 %258 }
 0x4fc   :  { %v1985_v53 = vmul.f32 %v259_v52, %v240_v44 }
 0x4fe   :  { %v268_v54 = vpack.c.bf16 %v1985_v53, %v1985_v53 }
 0x500   :  { %v270_v55 = vrot.slane %v268_v54, 1 }
 0x502   :  { %271 = vrot.lane.b32.xlu1 %v270_v55, %s1867_s3 }
 0x574   :  { %v272_v56 = vpop.permute.xlu1 %271 }
 0x575   :  { %1630 = vmatmul.mubr.msk.bf16.vlgmr.msra.gmra.mxu1 %vm113_vm3, %v272_v56 }
 0x576   :  { %1642 = vmatpush3.bf16.msra.mxu1 %v1926_v3  ;;  %1645 = vmatprep.mubr.msk.bf16.mxu1 %vm1864_vm1, %v1863_v0 }
 0x577   :  { %1643 = vmatprep.subr.bf16.mxu1 %v1863_v0 }
 0x57a   :  { %1644 = vmatpush3.bf16.msra.mxu1 %v1939_v5 }
 0x57b   :  { %1657 = vmatprep.subr.bf16.mxu1 %v1863_v0 }
 0x635   :  { %v310_v57 = vpop.f32.mrf.mxu1 }
 0x636   :  { %v317_v58 = vrot.slane %v310_v57, 4 }
 0x637   :  { %v1631_v59 = vpop.f32.mrf.mxu1 }
 0x638   :  { %v319_v60 = vadd.f32 %v317_v58, %v1961_v9 }
 0x639   :  { %v313_v61 = vpop.f32.mrf.mxu1 }
 0x63a   :  { %1779 = vtanh.f32 %v319_v60  ;;  %v320_v1 = vmul.f32 0.5, %v319_v60 }
 0x63b   :  { %v1632_v62 = vpop.f32.mrf.mxu1 }
 0x63c   :  { %1781 = vtanh.f32 %v320_v1 }
 0x647   :  { %v1780_v63 = vpop.eup %1779 }
 0x648   :  { %330 = vrot.lane.b32.xlu0 %v1780_v63, %s1866_s16 }
 0x649   :  { %v1782_v2 = vpop.eup %1781 }
 0x64a   :  { %v322_v4 = vadd.f32 1.0, %v1782_v2 }
 0x64c   :  { %v323_v7 = vmul.f32 0.5, %v322_v4 }
 0x64e   :  { %v328_v13 = vmul.f32 %v326_v11, %v323_v7 }
 0x6ba   :  { %v331_v8 = vpop.permute.xlu0 %330 }
 0x6bb   :  { %v333_v10 = vmul.f32 %v331_v8, %v323_v7 }
 0x6bd   :  { %335 = vrot.lane.b32.xlu1 %v333_v10, %s1867_s3 }
 0x72f   :  { %v336_v14 = vpop.permute.xlu1 %335 }
 0x730   :  { %v338_v15 = vadd.f32 %v336_v14, %v328_v13 }
 0x732   :  { %1783 = vtanh.f32 %v338_v15  ;;  %v409_v36 = vrot.slane %v338_v15, 6 }
 0x73f   :  { %v1784_v16 = vpop.eup %1783 }
 0x740   :  { %341 = vrot.lane.b32.xlu0 %v1784_v16, %s1866_s16 }
 0x7b2   :  { %v342_v17 = vpop.permute.xlu0 %341 }
 0x7b3   :  { %v2001_v18 = vmul.f32 %v342_v17, %v323_v7 }
 0x7b5   :  { %v351_v19 = vpack.c.bf16 %v2001_v18, %v2001_v18 }
 0x7b7   :  { %v353_v20 = vrot.slane %v351_v19, 2 }
 0x7b9   :  { %354 = vrot.lane.b32.xlu1 %v353_v20, %s1867_s3 }
 0x82b   :  { %v355_v21 = vpop.permute.xlu1 %354 }
 0x82c   :  { %1638 = vmatmul.mubr.msk.bf16.vlgmr.msra.gmra.mxu0 %vm113_vm3, %v355_v21 }
 0x82d   :  { %1650 = vmatpush3.bf16.msra.mxu0 %v1926_v3  ;;  %1653 = vmatprep.mubr.msk.bf16.mxu0 %vm1864_vm1, %v1863_v0 }
 0x82e   :  { %1651 = vmatprep.subr.bf16.mxu0 %v1863_v0 }
 0x831   :  { %1652 = vmatpush3.bf16.msra.mxu0 %v1939_v5 }
 0x832   :  { %1665 = vmatprep.subr.bf16.mxu0 %v1863_v0 }
 0x8ec   :  { %v393_v22 = vpop.f32.mrf.mxu0 }
 0x8ed   :  { %v400_v23 = vrot.slane %v393_v22, 2 }
 0x8ee   :  { %v1639_v24 = vpop.f32.mrf.mxu0 }
 0x8ef   :  { %v402_v25 = vadd.f32 %v400_v23, %v1961_v9 }
 0x8f0   :  { %v396_v26 = vpop.f32.mrf.mxu0 }
 0x8f1   :  { %1785 = vtanh.f32 %v402_v25  ;;  %v403_v29 = vmul.f32 0.5, %v402_v25 }
 0x8f2   :  { %v1640_v27 = vpop.f32.mrf.mxu0 }
 0x8f3   :  { %1787 = vtanh.f32 %v403_v29 }
 0x8fe   :  { %v1786_v28 = vpop.eup %1785 }
 0x8ff   :  { %413 = vrot.lane.b32.xlu0 %v1786_v28, %s1866_s16 }
 0x900   :  { %v1788_v30 = vpop.eup %1787 }
 0x901   :  { %v405_v32 = vadd.f32 1.0, %v1788_v30 }
 0x903   :  { %v406_v33 = vmul.f32 0.5, %v405_v32 }
 0x905   :  { %v411_v37 = vmul.f32 %v409_v36, %v406_v33 }
 0x971   :  { %v414_v34 = vpop.permute.xlu0 %413 }
 0x972   :  { %v416_v35 = vmul.f32 %v414_v34, %v406_v33 }
 0x974   :  { %418 = vrot.lane.b32.xlu1 %v416_v35, %s1867_s3 }
 0x9e6   :  { %v419_v38 = vpop.permute.xlu1 %418 }
 0x9e7   :  { %v421_v39 = vadd.f32 %v419_v38, %v411_v37 }
 0x9e9   :  { %1789 = vtanh.f32 %v421_v39  ;;  %v489_v58 = vrot.slane %v421_v39, 6 }
 0x9f6   :  { %v1790_v9 = vpop.eup %1789 }
 0x9f7   :  { %424 = vrot.lane.b32.xlu0 %v1790_v9, %s1866_s16 }
 0xa69   :  { %v425_v40 = vpop.permute.xlu0 %424 }
 0xa6a   :  { %v2017_v41 = vmul.f32 %v425_v40, %v406_v33 }
 0xa6c   :  { %v434_v42 = vpack.c.bf16 %v2017_v41, %v2017_v41 }
 0xa6e   :  { %v436_v43 = vrot.slane %v434_v42, 3 }
 0xa70   :  { %437 = vrot.lane.b32.xlu1 %v436_v43, %s1867_s3 }
 0xae2   :  { %v438_v44 = vpop.permute.xlu1 %437 }
 0xae3   :  { %1646 = vmatmul.mubr.msk.bf16.vlgmr.msra.gmra.mxu1 %vm113_vm3, %v438_v44 }
 0xae4   :  { %1658 = vmatpush3.bf16.msra.mxu1 %v1926_v3  ;;  %1661 = vmatprep.mubr.msk.bf16.mxu1 %vm1864_vm1, %v1863_v0 }
 0xae5   :  { %1659 = vmatprep.subr.bf16.mxu1 %v1863_v0 }
 0xae8   :  { %1660 = vmatpush3.bf16.msra.mxu1 %v1939_v5 }
 0xae9   :  { %1673 = vmatprep.subr.bf16.mxu1 %v1863_v0 }
 0xba3   :  { %v476_v45 = vpop.f32.mrf.mxu1 }
 0xba4   :  { %v482_v46 = vadd.f32 %v476_v45, %v1963_v12 }
 0xba5   :  { %v1647_v47 = vpop.f32.mrf.mxu1 }
 0xba6   :  { %1791 = vtanh.f32 %v482_v46  ;;  %v483_v51 = vmul.f32 0.5, %v482_v46 }
 0xba7   :  { %v479_v48 = vpop.f32.mrf.mxu1 }
 0xba8   :  { %1793 = vtanh.f32 %v483_v51 }
 0xba9   :  { %v1648_v49 = vpop.f32.mrf.mxu1 }
 0xbb3   :  { %v1792_v50 = vpop.eup %1791 }
 0xbb4   :  { %493 = vrot.lane.b32.xlu0 %v1792_v50, %s1866_s16 }
 0xbb5   :  { %v1794_v52 = vpop.eup %1793 }
 0xbb6   :  { %v485_v54 = vadd.f32 1.0, %v1794_v52 }
 0xbb8   :  { %v486_v55 = vmul.f32 0.5, %v485_v54 }
 0xbba   :  { %v491_v59 = vmul.f32 %v489_v58, %v486_v55 }
 0xc26   :  { %v494_v56 = vpop.permute.xlu0 %493 }
 0xc27   :  { %v496_v57 = vmul.f32 %v494_v56, %v486_v55 }
 0xc29   :  { %498 = vrot.lane.b32.xlu1 %v496_v57, %s1867_s3 }
 0xc9b   :  { %v499_v60 = vpop.permute.xlu1 %498 }
 0xc9c   :  { %v501_v61 = vadd.f32 %v499_v60, %v491_v59 }
 0xc9e   :  { %1795 = vtanh.f32 %v501_v61  ;;  %v570_v21 = vrot.slane %v501_v61, 6 }
 0xcab   :  { %v1796_v62 = vpop.eup %1795 }
 0xcac   :  { %504 = vrot.lane.b32.xlu0 %v1796_v62, %s1866_s16 }
 0xd1e   :  { %v505_v63 = vpop.permute.xlu0 %504 }
 0xd1f   :  { %v2033_v1 = vmul.f32 %v505_v63, %v486_v55 }
 0xd21   :  { %v513_v2 = vpack.c.bf16 %v2033_v1, %v2033_v1 }
 0xd23   :  { %515 = vrot.lane.b32.xlu1 %v513_v2, %s1867_s3 }
 0xd95   :  { %v516_v4 = vpop.permute.xlu1 %515 }
 0xd96   :  { %1654 = vmatmul.mubr.msk.bf16.vlgmr.msra.gmra.mxu0 %vm113_vm3, %v516_v4 }
 0xd97   :  { %1666 = vmatpush3.bf16.msra.mxu0 %v1926_v3  ;;  %1669 = vmatprep.mubr.msk.bf16.mxu0 %vm1864_vm1, %v1863_v0 }
 0xd98   :  { %1667 = vmatprep.subr.bf16.mxu0 %v1863_v0 }
 0xd9b   :  { %1668 = vmatpush3.bf16.msra.mxu0 %v1939_v5 }
 0xd9c   :  { %1681 = vmatprep.subr.bf16.mxu0 %v1863_v0 }
 0xe56   :  { %v554_v7 = vpop.f32.mrf.mxu0 }
 0xe57   :  { %v561_v8 = vrot.slane %v554_v7, 6 }
 0xe58   :  { %v1655_v10 = vpop.f32.mrf.mxu0 }
 0xe59   :  { %v563_v11 = vadd.f32 %v561_v8, %v1963_v12 }
 0xe5a   :  { %v557_v13 = vpop.f32.mrf.mxu0 }
 0xe5b   :  { %1797 = vtanh.f32 %v563_v11  ;;  %v564_v3 = vmul.f32 0.5, %v563_v11 }
 0xe5c   :  { %v1656_v14 = vpop.f32.mrf.mxu0 }
 0xe5d   :  { %1799 = vtanh.f32 %v564_v3 }
 0xe68   :  { %v1798_v15 = vpop.eup %1797 }
 0xe69   :  { %574 = vrot.lane.b32.xlu0 %v1798_v15, %s1866_s16 }
 0xe6a   :  { %v1800_v16 = vpop.eup %1799 }
 0xe6b   :  { %v566_v17 = vadd.f32 1.0, %v1800_v16 }
 0xe6d   :  { %v567_v19 = vmul.f32 0.5, %v566_v17  ;;  %v2092_v17 = vld [vmem:[%s2222_s5] sm:$0xff]  }
 0xe6f   :  { %v572_v22 = vmul.f32 %v570_v21, %v567_v19 }
 0xedb   :  { %v575_v20 = vpop.permute.xlu0 %574 }
 0xedc   :  { %v577_v5 = vmul.f32 %v575_v20, %v567_v19 }
 0xede   :  { %579 = vrot.lane.b32.xlu1 %v577_v5, %s1867_s3 }
 0xf50   :  { %v580_v23 = vpop.permute.xlu1 %579 }
 0xf51   :  { %v582_v24 = vadd.f32 %v580_v23, %v572_v22 }
 0xf53   :  { %1801 = vtanh.f32 %v582_v24  ;;  %v652_v45 = vrot.slane %v582_v24, 6 }
 0xf60   :  { %v1802_v25 = vpop.eup %1801 }
 0xf61   :  { %585 = vrot.lane.b32.xlu0 %v1802_v25, %s1866_s16 }
 0xfd3   :  { %v586_v26 = vpop.permute.xlu0 %585 }
 0xfd4   :  { %v2049_v27 = vmul.f32 %v586_v26, %v567_v19  ;;  %v1762_v19 = vld [vmem:[%s2223_s4 + $0x8] sm:$0xff]  }
 0xfd6   :  { %v594_v28 = vpack.c.bf16 %v2049_v27, %v2049_v27 }
 0xfd8   :  { %v596_v29 = vrot.slane %v594_v28, 1 }
 0xfda   :  { %597 = vrot.lane.b32.xlu1 %v596_v29, %s1867_s3 }
0x104c   :  { %v598_v30 = vpop.permute.xlu1 %597 }
0x104d   :  { %1662 = vmatmul.mubr.msk.bf16.vlgmr.msra.gmra.mxu1 %vm113_vm3, %v598_v30  ;;  %v1530_v30 = vld [vmem:[%s2224_s6] ss:$0 sm:$0xff] }
0x104e   :  { %1677 = vmatprep.mubr.msk.bf16.mxu1 %vm1864_vm1, %v1863_v0  ;;  %1674 = vmatpush3.bf16.msra.mxu1 %v1762_v19 }
0x104f   :  { %1675 = vmatprep.subr.bf16.mxu1 %v1863_v0 }
0x110d   :  { %v636_v32 = vpop.f32.mrf.mxu1 }
0x110e   :  { %v643_v33 = vrot.slane %v636_v32, 4 }
0x110f   :  { %v1663_v34 = vpop.f32.mrf.mxu1 }
0x1110   :  { %v645_v35 = vadd.f32 %v643_v33, %v1963_v12 }
0x1111   :  { %v639_v36 = vpop.f32.mrf.mxu1 }
0x1112   :  { %1803 = vtanh.f32 %v645_v35  ;;  %v646_v39 = vmul.f32 0.5, %v645_v35 }
0x1113   :  { %v1664_v37 = vpop.f32.mrf.mxu1 }
0x1114   :  { %1805 = vtanh.f32 %v646_v39 }
0x111f   :  { %v1804_v38 = vpop.eup %1803 }
0x1120   :  { %656 = vrot.lane.b32.xlu0 %v1804_v38, %s1866_s16 }
0x1121   :  { %v1806_v9 = vpop.eup %1805 }
0x1122   :  { %v648_v40 = vadd.f32 1.0, %v1806_v9 }
0x1124   :  { %v649_v42 = vmul.f32 0.5, %v648_v40 }
0x1126   :  { %v654_v46 = vmul.f32 %v652_v45, %v649_v42 }
0x1192   :  { %v657_v43 = vpop.permute.xlu0 %656 }
0x1193   :  { %v659_v44 = vmul.f32 %v657_v43, %v649_v42 }
0x1195   :  { %661 = vrot.lane.b32.xlu1 %v659_v44, %s1867_s3 }
0x1207   :  { %v662_v47 = vpop.permute.xlu1 %661 }
0x1208   :  { %v664_v48 = vadd.f32 %v662_v47, %v654_v46 }
0x120a   :  { %1807 = vtanh.f32 %v664_v48 }
0x1217   :  { %v1808_v49 = vpop.eup %1807 }
0x1218   :  { %667 = vrot.lane.b32.xlu0 %v1808_v49, %s1866_s16 }
0x128a   :  { %v668_v50 = vpop.permute.xlu0 %667 }
0x128b   :  { %v670_v51 = vmul.f32 %v668_v50, %v649_v42 }
0x128d   :  { %v676_v52 = vpack.c.bf16 %v670_v51, %v670_v51 }
0x128f   :  { %v678_v54 = vrot.slane %v676_v52, 2 }
0x1291   :  { %679 = vrot.lane.b32.xlu1 %v678_v54, %s1867_s3 }
0x1303   :  { %v680_v55 = vpop.permute.xlu1 %679 }
0x1304   :  { %1670 = vmatmul.mubr.msk.bf16.vlgmr.msra.gmra.mxu0 %vm113_vm3, %v680_v55 }
0x1305   :  { %1685 = vmatprep.mubr.msk.bf16.mxu0 %vm1864_vm1, %v1863_v0 }
0x13c4   :  { %v718_v56 = vpop.f32.mrf.mxu0 }
0x13c5   :  { %v725_v57 = vrot.slane %v718_v56, 2 }
0x13c6   :  { %v1671_v58 = vpop.f32.mrf.mxu0 }
0x13c7   :  { %v727_v59 = vadd.f32 %v725_v57, %v1963_v12  ;;  %v734_v12 = vrot.slane %v664_v48, 6 }
0x13c8   :  { %v721_v60 = vpop.f32.mrf.mxu0 }
0x13c9   :  { %1809 = vtanh.f32 %v727_v59  ;;  %v728_v63 = vmul.f32 0.5, %v727_v59 }
0x13ca   :  { %v1672_v61 = vpop.f32.mrf.mxu0 }
0x13cb   :  { %1811 = vtanh.f32 %v728_v63 }
0x13d6   :  { %v1810_v62 = vpop.eup %1809 }
0x13d7   :  { %738 = vrot.lane.b32.xlu0 %v1810_v62, %s1866_s16 }
0x13d8   :  { %v1812_v2 = vpop.eup %1811 }
0x13d9   :  { %v730_v4 = vadd.f32 1.0, %v1812_v2 }
0x13db   :  { %v731_v7 = vmul.f32 0.5, %v730_v4 }
0x13dd   :  { %v736_v11 = vmul.f32 %v734_v12, %v731_v7 }
0x1449   :  { %v739_v8 = vpop.permute.xlu0 %738 }
0x144a   :  { %v741_v10 = vmul.f32 %v739_v8, %v731_v7 }
0x144c   :  { %743 = vrot.lane.b32.xlu1 %v741_v10, %s1867_s3 }
0x1450   :  { %181 = vrot.lane.b32.xlu1 %v1969_v31, %s1867_s3 }
0x1454   :  { %346 = vrot.lane.b32.xlu1 %v2001_v18, %s1867_s3 }
0x1458   :  { %509 = vrot.lane.b32.xlu1 %v2033_v1, %s1867_s3  ;;  %v2079_v1 = vld [vmem:[%s2222_s5 + $0x8] sm:$0xff]  }
0x1459   :  { %1682 = vmatpush3.bf16.msra.mxu0 %v2079_v1 }
0x145a   :  { %1683 = vmatprep.subr.bf16.mxu0 %v1863_v0 }
0x145c   :  { %672 = vrot.lane.b32.xlu1 %v670_v51, %s1867_s3 }
0x145d   :  { %1684 = vmatpush3.bf16.msra.mxu0 %v2092_v17 }
0x145e   :  { %1697 = vmatprep.subr.bf16.mxu0 %v1863_v0 }
0x1460   :  { %1686 = vmatmul.mubr.bf16.vlgmr.msra.gmra.mxu0 %v1865_v6 }
0x1461   :  { %1698 = vmatpush3.bf16.msra.mxu0 %v2079_v1  ;;  %1701 = vmatprep.mubr.msk.bf16.mxu0 %vm1864_vm1, %v1863_v0 }
0x1462   :  { %1699 = vmatprep.subr.bf16.mxu0 %v1863_v0 }
0x1465   :  { %1700 = vmatpush3.bf16.msra.mxu0 %v2092_v17 }
0x1466   :  { %1713 = vmatprep.subr.bf16.mxu0 %v1863_v0 }
0x14be   :  { %v744_v13 = vpop.permute.xlu1 %743 }
0x14bf   :  { %v746_v14 = vadd.f32 %v744_v13, %v736_v11 }
0x14c1   :  { %1813 = vtanh.f32 %v746_v14 }
0x14c2   :  { %v182_v15 = vpop.permute.xlu1 %181 }
0x14c3   :  { %185 = vst.msk [vmem:[#allocation2] sm:$0x3] %vm184_vm4, %v182_v15 }
0x14c6   :  { %v347_v3 = vpop.permute.xlu1 %346 }
0x14c7   :  { %350 = vst.msk [vmem:[#allocation2] sm:$0x30] %vm349_vm5, %v347_v3 }
0x14ca   :  { %v510_v31 = vpop.permute.xlu1 %509 }
0x14cb   :  { %512 = vst.msk [vmem:[#allocation2 + $0x8] sm:$0x3] %vm184_vm4, %v510_v31 }
0x14ce   :  { %v1814_v16 = vpop.eup %1813  ;;  %v673_v18 = vpop.permute.xlu1 %672 }
0x14cf   :  { %675 = vst.msk [vmem:[#allocation2 + $0x8] sm:$0x30] %vm349_vm5, %v673_v18  ;;  %749 = vrot.lane.b32.xlu0 %v1814_v16, %s1866_s16 }
0x14d3   :  { %263 = vrot.lane.b32.xlu0 %v1985_v53, %s1867_s3  ;;  %v1764_v53 = vld [vmem:[%s2223_s4] sm:$0xff]  }
0x14d4   :  { %1676 = vmatpush3.bf16.msra.mxu1 %v1764_v53 }
0x14d5   :  { %1689 = vmatprep.subr.bf16.mxu1 %v1863_v0 }
0x14d7   :  { %429 = vrot.lane.b32.xlu0 %v2017_v41, %s1867_s3 }
0x14db   :  { %590 = vrot.lane.b32.xlu0 %v2049_v27, %s1867_s3 }
0x1520   :  { %v878_v26 = vpop.f32.mrf.mxu0 }
0x1522   :  { %v1687_v27 = vpop.f32.mrf.mxu0 }
0x1524   :  { %v881_v28 = vpop.f32.mrf.mxu0 }
0x1526   :  { %v1688_v29 = vpop.f32.mrf.mxu0 }
0x1541   :  { %v750_v41 = vpop.permute.xlu0 %749 }
0x1542   :  { %v752_v20 = vmul.f32 %v750_v41, %v731_v7 }
0x1544   :  { %754 = vrot.lane.b32.xlu0 %v752_v20, %s1867_s3 }
0x1545   :  { %v264_v6 = vpop.permute.xlu0 %263 }
0x1546   :  { %267 = vst.msk [vmem:[#allocation2] sm:$0xc] %vm266_vm6, %v264_v6 }
0x1549   :  { %v430_v5 = vpop.permute.xlu0 %429 }
0x154a   :  { %433 = vst.msk [vmem:[#allocation2] sm:$0xc0] %vm432_vm7, %v430_v5 }
0x154d   :  { %v591_v21 = vpop.permute.xlu0 %590 }
0x154e   :  { %593 = vst.msk [vmem:[#allocation2 + $0x8] sm:$0xc] %vm266_vm6, %v591_v21 }
0x1551   :  { %v758_v23 = vld [vmem:[#allocation2] sm:$0xff] }
0x15b6   :  { %v755_v22 = vpop.permute.xlu0 %754 }
0x15b7   :  { %757 = vst.msk [vmem:[#allocation2 + $0x8] sm:$0xc0] %vm432_vm7, %v755_v22 }
0x15be   :  { %v759_v24 = vld [vmem:[#allocation2 + $0x8] sm:$0xff] }
0x15bf   :  { %v760_v25 = vpack.c.bf16 %v759_v24, %v758_v23 }
0x15c1   :  { %1678 = vmatmul.mubr.msk.bf16.vlgmr.msra.gmra.mxu1 %vm113_vm3, %v760_v25 }
0x15c2   :  { %1690 = vmatpush3.bf16.msra.mxu1 %v2079_v1  ;;  %1693 = vmatprep.mubr.msk.bf16.mxu1 %vm1864_vm1, %v1863_v0 }
0x15c3   :  { %1691 = vmatprep.subr.bf16.mxu1 %v1863_v0 }
0x15c6   :  { %1692 = vmatpush3.bf16.msra.mxu1 %v2092_v17 }
0x15c7   :  { %1705 = vmatprep.subr.bf16.mxu1 %v1863_v0 }
0x1681   :  { %v821_v32 = vpop.f32.mrf.mxu1 }
0x1682   :  { %v2122_v33 = vadd.f32 %v1530_v30, %v821_v32 }
0x1683   :  { %v1679_v34 = vpop.f32.mrf.mxu1 }
0x1684   :  { %v884_v35 = vadd.f32 %v878_v26, %v2122_v33 }
0x1685   :  { %v824_v36 = vpop.f32.mrf.mxu1 }
0x1686   :  { %1815 = vtanh.f32 %v884_v35  ;;  %v2125_v37 = vadd.f32 %v1530_v30, %v824_v36  ;;  %v885_v9 = vmul.f32 0.5, %v884_v35 }
0x1687   :  { %v1680_v38 = vpop.f32.mrf.mxu1 }
0x1688   :  { %1817 = vtanh.f32 %v885_v9 }
0x1693   :  { %v1816_v39 = vpop.eup %1815 }
0x1694   :  { %892 = vrot.lane.b32.xlu1 %v1816_v39, %s1866_s16 }
0x1695   :  { %v1818_v40 = vpop.eup %1817 }
0x1696   :  { %v887_v42 = vadd.f32 1.0, %v1818_v40 }
0x1698   :  { %v888_v43 = vmul.f32 0.5, %v887_v42 }
0x169a   :  { %v890_v46 = vmul.f32 0.0, %v888_v43 }
0x1706   :  { %v893_v44 = vpop.permute.xlu1 %892 }
0x1707   :  { %v895_v45 = vmul.f32 %v893_v44, %v888_v43 }
0x1709   :  { %897 = vrot.lane.b32.xlu0 %v895_v45, %s1867_s3 }
0x177b   :  { %v898_v47 = vpop.permute.xlu0 %897 }
0x177c   :  { %v900_v48 = vadd.f32 %v898_v47, %v890_v46 }
0x177e   :  { %1819 = vtanh.f32 %v900_v48  ;;  %v964_v10 = vrot.slane %v900_v48, 6 }
0x178b   :  { %v1820_v49 = vpop.eup %1819 }
0x178c   :  { %903 = vrot.lane.b32.xlu1 %v1820_v49, %s1866_s16 }
0x17fe   :  { %v904_v50 = vpop.permute.xlu1 %903 }
0x17ff   :  { %v906_v51 = vmul.f32 %v904_v50, %v888_v43 }
0x1801   :  { %v907_v52 = vpack.c.bf16 %v906_v51, %v906_v51 }
0x1803   :  { %909 = vrot.lane.b32.xlu0 %v907_v52, %s1867_s3 }
0x1875   :  { %v910_v54 = vpop.permute.xlu0 %909 }
0x1876   :  { %1694 = vmatmul.mubr.msk.bf16.vlgmr.msra.gmra.mxu1 %vm113_vm3, %v910_v54 }
0x1877   :  { %1706 = vmatpush3.bf16.msra.mxu1 %v2079_v1  ;;  %1709 = vmatprep.mubr.msk.bf16.mxu1 %vm1864_vm1, %v1863_v0 }
0x1878   :  { %1707 = vmatprep.subr.bf16.mxu1 %v1863_v0 }
0x187b   :  { %1708 = vmatpush3.bf16.msra.mxu1 %v2092_v17 }
0x187c   :  { %1721 = vmatprep.subr.bf16.mxu1 %v1863_v0 }
0x1936   :  { %v948_v55 = vpop.f32.mrf.mxu1 }
0x1937   :  { %v955_v56 = vrot.slane %v948_v55, 6 }
0x1938   :  { %v1695_v57 = vpop.f32.mrf.mxu1 }
0x1939   :  { %v957_v58 = vadd.f32 %v955_v56, %v2122_v33 }
0x193a   :  { %v951_v59 = vpop.f32.mrf.mxu1 }
0x193b   :  { %1821 = vtanh.f32 %v957_v58  ;;  %v958_v62 = vmul.f32 0.5, %v957_v58 }
0x193c   :  { %v1696_v60 = vpop.f32.mrf.mxu1 }
0x193d   :  { %1823 = vtanh.f32 %v958_v62 }
0x1948   :  { %v1822_v61 = vpop.eup %1821 }
0x1949   :  { %968 = vrot.lane.b32.xlu1 %v1822_v61, %s1866_s16 }
0x194a   :  { %v1824_v63 = vpop.eup %1823 }
0x194b   :  { %v960_v2 = vadd.f32 1.0, %v1824_v63 }
0x194d   :  { %v961_v4 = vmul.f32 0.5, %v960_v2 }
0x194f   :  { %v966_v12 = vmul.f32 %v964_v10, %v961_v4 }
0x19bb   :  { %v969_v7 = vpop.permute.xlu1 %968 }
0x19bc   :  { %v971_v8 = vmul.f32 %v969_v7, %v961_v4 }
0x19be   :  { %973 = vrot.lane.b32.xlu0 %v971_v8, %s1867_s3 }
0x1a30   :  { %v974_v11 = vpop.permute.xlu0 %973 }
0x1a31   :  { %v976_v13 = vadd.f32 %v974_v11, %v966_v12 }
0x1a33   :  { %1825 = vtanh.f32 %v976_v13  ;;  %v1041_v28 = vrot.slane %v976_v13, 6 }
0x1a40   :  { %v1826_v14 = vpop.eup %1825 }
0x1a41   :  { %979 = vrot.lane.b32.xlu1 %v1826_v14, %s1866_s16 }
0x1ab3   :  { %v980_v15 = vpop.permute.xlu1 %979 }
0x1ab4   :  { %v982_v3 = vmul.f32 %v980_v15, %v961_v4 }
0x1ab6   :  { %v983_v31 = vpack.c.bf16 %v982_v3, %v982_v3 }
0x1ab8   :  { %v985_v16 = vrot.slane %v983_v31, 1 }
0x1aba   :  { %986 = vrot.lane.b32.xlu0 %v985_v16, %s1867_s3 }
0x1b2c   :  { %v987_v18 = vpop.permute.xlu0 %986 }
0x1b2d   :  { %1702 = vmatmul.mubr.msk.bf16.vlgmr.msra.gmra.mxu0 %vm113_vm3, %v987_v18 }
0x1b2e   :  { %1714 = vmatpush3.bf16.msra.mxu0 %v2079_v1  ;;  %1717 = vmatprep.mubr.msk.bf16.mxu0 %vm1864_vm1, %v1863_v0 }
0x1b2f   :  { %1715 = vmatprep.subr.bf16.mxu0 %v1863_v0 }
0x1b32   :  { %1716 = vmatpush3.bf16.msra.mxu0 %v2092_v17 }
0x1b33   :  { %1729 = vmatprep.subr.bf16.mxu0 %v1863_v0 }
0x1bed   :  { %v1025_v19 = vpop.f32.mrf.mxu0 }
0x1bee   :  { %v1032_v53 = vrot.slane %v1025_v19, 4 }
0x1bef   :  { %v1703_v41 = vpop.f32.mrf.mxu0 }
0x1bf0   :  { %v1034_v20 = vadd.f32 %v1032_v53, %v2122_v33 }
0x1bf1   :  { %v1028_v6 = vpop.f32.mrf.mxu0 }
0x1bf2   :  { %1827 = vtanh.f32 %v1034_v20  ;;  %v1035_v22 = vmul.f32 0.5, %v1034_v20 }
0x1bf3   :  { %v1704_v5 = vpop.f32.mrf.mxu0 }
0x1bf4   :  { %1829 = vtanh.f32 %v1035_v22 }
0x1bff   :  { %v1828_v21 = vpop.eup %1827 }
0x1c00   :  { %1045 = vrot.lane.b32.xlu1 %v1828_v21, %s1866_s16 }
0x1c01   :  { %v1830_v23 = vpop.eup %1829 }
0x1c02   :  { %v1037_v24 = vadd.f32 1.0, %v1830_v23 }
0x1c04   :  { %v1038_v25 = vmul.f32 0.5, %v1037_v24 }
0x1c06   :  { %v1043_v29 = vmul.f32 %v1041_v28, %v1038_v25 }
0x1c72   :  { %v1046_v26 = vpop.permute.xlu1 %1045 }
0x1c73   :  { %v1048_v27 = vmul.f32 %v1046_v26, %v1038_v25 }
0x1c75   :  { %1050 = vrot.lane.b32.xlu0 %v1048_v27, %s1867_s3 }
0x1ce7   :  { %v1051_v30 = vpop.permute.xlu0 %1050 }
0x1ce8   :  { %v1053_v32 = vadd.f32 %v1051_v30, %v1043_v29 }
0x1cea   :  { %1831 = vtanh.f32 %v1053_v32  ;;  %v1118_v55 = vrot.slane %v1053_v32, 6 }
0x1cf7   :  { %v1832_v34 = vpop.eup %1831 }
0x1cf8   :  { %1056 = vrot.lane.b32.xlu1 %v1832_v34, %s1866_s16 }
0x1d6a   :  { %v1057_v35 = vpop.permute.xlu1 %1056 }
0x1d6b   :  { %v1059_v36 = vmul.f32 %v1057_v35, %v1038_v25 }
0x1d6d   :  { %v1060_v38 = vpack.c.bf16 %v1059_v36, %v1059_v36 }
0x1d6f   :  { %v1062_v39 = vrot.slane %v1060_v38, 2 }
0x1d71   :  { %1063 = vrot.lane.b32.xlu0 %v1062_v39, %s1867_s3 }
0x1de3   :  { %v1064_v9 = vpop.permute.xlu0 %1063 }
0x1de4   :  { %1710 = vmatmul.mubr.msk.bf16.vlgmr.msra.gmra.mxu1 %vm113_vm3, %v1064_v9 }
0x1de5   :  { %1722 = vmatpush3.bf16.msra.mxu1 %v2079_v1  ;;  %1725 = vmatprep.mubr.msk.bf16.mxu1 %vm1864_vm1, %v1863_v0 }
0x1de6   :  { %1723 = vmatprep.subr.bf16.mxu1 %v1863_v0 }
0x1de9   :  { %1724 = vmatpush3.bf16.msra.mxu1 %v2092_v17 }
0x1dea   :  { %1737 = vmatprep.subr.bf16.mxu1 %v1863_v0 }
0x1ea4   :  { %v1102_v40 = vpop.f32.mrf.mxu1 }
0x1ea5   :  { %v1109_v42 = vrot.slane %v1102_v40, 2 }
0x1ea6   :  { %v1711_v43 = vpop.f32.mrf.mxu1 }
0x1ea7   :  { %v1111_v44 = vadd.f32 %v1109_v42, %v2122_v33 }
0x1ea8   :  { %v1105_v45 = vpop.f32.mrf.mxu1 }
0x1ea9   :  { %1833 = vtanh.f32 %v1111_v44  ;;  %v1112_v48 = vmul.f32 0.5, %v1111_v44 }
0x1eaa   :  { %v1712_v46 = vpop.f32.mrf.mxu1 }
0x1eab   :  { %1835 = vtanh.f32 %v1112_v48 }
0x1eb6   :  { %v1834_v47 = vpop.eup %1833 }
0x1eb7   :  { %1122 = vrot.lane.b32.xlu1 %v1834_v47, %s1866_s16 }
0x1eb8   :  { %v1836_v49 = vpop.eup %1835 }
0x1eb9   :  { %v1114_v50 = vadd.f32 1.0, %v1836_v49 }
0x1ebb   :  { %v1115_v51 = vmul.f32 0.5, %v1114_v50 }
0x1ebd   :  { %v1120_v56 = vmul.f32 %v1118_v55, %v1115_v51 }
0x1f29   :  { %v1123_v52 = vpop.permute.xlu1 %1122 }
0x1f2a   :  { %v1125_v54 = vmul.f32 %v1123_v52, %v1115_v51 }
0x1f2c   :  { %1127 = vrot.lane.b32.xlu0 %v1125_v54, %s1867_s3 }
0x1f9e   :  { %v1128_v57 = vpop.permute.xlu0 %1127 }
0x1f9f   :  { %v1130_v58 = vadd.f32 %v1128_v57, %v1120_v56 }
0x1fa1   :  { %1837 = vtanh.f32 %v1130_v58  ;;  %v1192_v16 = vrot.slane %v1130_v58, 6 }
0x1fae   :  { %v1838_v33 = vpop.eup %1837 }
0x1faf   :  { %1133 = vrot.lane.b32.xlu1 %v1838_v33, %s1866_s16 }
0x2021   :  { %v1134_v59 = vpop.permute.xlu1 %1133 }
0x2022   :  { %v1136_v60 = vmul.f32 %v1134_v59, %v1115_v51 }
0x2024   :  { %v1137_v61 = vpack.c.bf16 %v1136_v60, %v1136_v60 }
0x2026   :  { %v1139_v62 = vrot.slane %v1137_v61, 3 }
0x2028   :  { %1140 = vrot.lane.b32.xlu0 %v1139_v62, %s1867_s3 }
0x209a   :  { %v1141_v63 = vpop.permute.xlu0 %1140 }
0x209b   :  { %1718 = vmatmul.mubr.msk.bf16.vlgmr.msra.gmra.mxu0 %vm113_vm3, %v1141_v63 }
0x209c   :  { %1730 = vmatpush3.bf16.msra.mxu0 %v2079_v1  ;;  %1733 = vmatprep.mubr.msk.bf16.mxu0 %vm1864_vm1, %v1863_v0 }
0x209d   :  { %1731 = vmatprep.subr.bf16.mxu0 %v1863_v0 }
0x20a0   :  { %1732 = vmatpush3.bf16.msra.mxu0 %v2092_v17 }
0x20a1   :  { %1745 = vmatprep.subr.bf16.mxu0 %v1863_v0 }
0x215b   :  { %v1179_v2 = vpop.f32.mrf.mxu0 }
0x215c   :  { %v1185_v4 = vadd.f32 %v1179_v2, %v2125_v37 }
0x215d   :  { %v1719_v7 = vpop.f32.mrf.mxu0 }
0x215e   :  { %1839 = vtanh.f32 %v1185_v4  ;;  %v1186_v11 = vmul.f32 0.5, %v1185_v4 }
0x215f   :  { %v1182_v8 = vpop.f32.mrf.mxu0 }
0x2160   :  { %1841 = vtanh.f32 %v1186_v11 }
0x2161   :  { %v1720_v10 = vpop.f32.mrf.mxu0 }
0x216b   :  { %v1840_v12 = vpop.eup %1839 }
0x216c   :  { %1196 = vrot.lane.b32.xlu1 %v1840_v12, %s1866_s16 }
0x216d   :  { %v1842_v13 = vpop.eup %1841 }
0x216e   :  { %v1188_v14 = vadd.f32 1.0, %v1842_v13 }
0x2170   :  { %v1189_v15 = vmul.f32 0.5, %v1188_v14 }
0x2172   :  { %v1194_v18 = vmul.f32 %v1192_v16, %v1189_v15 }
0x21de   :  { %v1197_v3 = vpop.permute.xlu1 %1196 }
0x21df   :  { %v1199_v31 = vmul.f32 %v1197_v3, %v1189_v15 }
0x21e1   :  { %1201 = vrot.lane.b32.xlu0 %v1199_v31, %s1867_s3 }
0x2253   :  { %v1202_v19 = vpop.permute.xlu0 %1201 }
0x2254   :  { %v1204_v53 = vadd.f32 %v1202_v19, %v1194_v18 }
0x2256   :  { %1843 = vtanh.f32 %v1204_v53 }
0x2263   :  { %v1844_v41 = vpop.eup %1843 }
0x2264   :  { %1207 = vrot.lane.b32.xlu1 %v1844_v41, %s1866_s16 }
0x22d6   :  { %v1208_v20 = vpop.permute.xlu1 %1207 }
0x22d7   :  { %v1210_v6 = vmul.f32 %v1208_v20, %v1189_v15 }
0x22d9   :  { %v1211_v5 = vpack.c.bf16 %v1210_v6, %v1210_v6 }
0x22db   :  { %1213 = vrot.lane.b32.xlu0 %v1211_v5, %s1867_s3 }
0x234d   :  { %v1214_v21 = vpop.permute.xlu0 %1213 }
0x234e   :  { %1726 = vmatmul.mubr.msk.bf16.vlgmr.msra.gmra.mxu1 %vm113_vm3, %v1214_v21 }
0x234f   :  { %1738 = vmatpush3.bf16.msra.mxu1 %v2079_v1  ;;  %1741 = vmatprep.mubr.msk.bf16.mxu1 %vm1864_vm1, %v1863_v0 }
0x2350   :  { %1739 = vmatprep.subr.bf16.mxu1 %v1863_v0 }
0x2353   :  { %1740 = vmatpush3.bf16.msra.mxu1 %v2092_v17  ;;  %v1268_v17 = vrot.slane %v1204_v53, 6 }
0x240e   :  { %v1252_v22 = vpop.f32.mrf.mxu1 }
0x240f   :  { %v1259_v23 = vrot.slane %v1252_v22, 6 }
0x2410   :  { %v1727_v24 = vpop.f32.mrf.mxu1 }
0x2411   :  { %v1261_v25 = vadd.f32 %v1259_v23, %v2125_v37  ;;  %v1766_v23 = vld [vmem:[%s2225_s7] sm:$0xff]  }
0x2412   :  { %v1255_v26 = vpop.f32.mrf.mxu1 }
0x2413   :  { %1845 = vtanh.f32 %v1261_v25  ;;  %v1262_v29 = vmul.f32 0.5, %v1261_v25 }
0x2414   :  { %v1728_v27 = vpop.f32.mrf.mxu1 }
0x2415   :  { %1847 = vtanh.f32 %v1262_v29 }
0x2420   :  { %v1846_v28 = vpop.eup %1845 }
0x2421   :  { %1272 = vrot.lane.b32.xlu1 %v1846_v28, %s1866_s16 }
0x2422   :  { %v1848_v1 = vpop.eup %1847 }
0x2423   :  { %v1264_v30 = vadd.f32 1.0, %v1848_v1  ;;  %v1543_v1 = vld [vmem:[%s2226_s8] ss:$0 sm:$0xff] }
0x2425   :  { %v1265_v32 = vmul.f32 0.5, %v1264_v30 }
0x2427   :  { %v1270_v36 = vmul.f32 %v1268_v17, %v1265_v32 }
0x2493   :  { %v1273_v34 = vpop.permute.xlu1 %1272 }
0x2494   :  { %v1275_v35 = vmul.f32 %v1273_v34, %v1265_v32 }
0x2496   :  { %1277 = vrot.lane.b32.xlu0 %v1275_v35, %s1867_s3 }
0x2508   :  { %v1278_v38 = vpop.permute.xlu0 %1277 }
0x2509   :  { %v1280_v39 = vadd.f32 %v1278_v38, %v1270_v36 }
0x250b   :  { %1849 = vtanh.f32 %v1280_v39  ;;  %v1345_v59 = vrot.slane %v1280_v39, 6 }
0x2518   :  { %v1850_v9 = vpop.eup %1849 }
0x2519   :  { %1283 = vrot.lane.b32.xlu1 %v1850_v9, %s1866_s16 }
0x258b   :  { %v1284_v40 = vpop.permute.xlu1 %1283 }
0x258c   :  { %v1286_v42 = vmul.f32 %v1284_v40, %v1265_v32 }
0x258e   :  { %v1287_v43 = vpack.c.bf16 %v1286_v42, %v1286_v42 }
0x2590   :  { %v1289_v44 = vrot.slane %v1287_v43, 1 }
0x2592   :  { %1290 = vrot.lane.b32.xlu0 %v1289_v44, %s1867_s3 }
0x2604   :  { %v1291_v45 = vpop.permute.xlu0 %1290 }
0x2605   :  { %1734 = vmatmul.mubr.msk.bf16.vlgmr.msra.gmra.mxu0 %vm113_vm3, %v1291_v45 }
0x2606   :  { %1749 = vmatprep.mubr.msk.bf16.mxu0 %vm1864_vm1, %v1863_v0 }
0x26c5   :  { %v1329_v46 = vpop.f32.mrf.mxu0 }
0x26c6   :  { %v1336_v47 = vrot.slane %v1329_v46, 4 }
0x26c7   :  { %v1735_v48 = vpop.f32.mrf.mxu0 }
0x26c8   :  { %v1338_v49 = vadd.f32 %v1336_v47, %v2125_v37 }
0x26c9   :  { %v1332_v50 = vpop.f32.mrf.mxu0 }
0x26ca   :  { %1851 = vtanh.f32 %v1338_v49  ;;  %v1339_v54 = vmul.f32 0.5, %v1338_v49 }
0x26cb   :  { %v1736_v51 = vpop.f32.mrf.mxu0 }
0x26cc   :  { %1853 = vtanh.f32 %v1339_v54 }
0x26d7   :  { %v1852_v52 = vpop.eup %1851 }
0x26d8   :  { %1349 = vrot.lane.b32.xlu1 %v1852_v52, %s1866_s16 }
0x26d9   :  { %v1854_v55 = vpop.eup %1853 }
0x26da   :  { %v1341_v56 = vadd.f32 1.0, %v1854_v55 }
0x26dc   :  { %v1342_v57 = vmul.f32 0.5, %v1341_v56 }
0x26de   :  { %v1347_v60 = vmul.f32 %v1345_v59, %v1342_v57 }
0x274a   :  { %v1350_v58 = vpop.permute.xlu1 %1349 }
0x274b   :  { %v1352_v33 = vmul.f32 %v1350_v58, %v1342_v57 }
0x274d   :  { %1354 = vrot.lane.b32.xlu0 %v1352_v33, %s1867_s3 }
0x27bf   :  { %v1355_v61 = vpop.permute.xlu0 %1354 }
0x27c0   :  { %v1357_v62 = vadd.f32 %v1355_v61, %v1347_v60 }
0x27c2   :  { %1855 = vtanh.f32 %v1357_v62  ;;  %v1422_v6 = vrot.slane %v1357_v62, 6 }
0x27cf   :  { %v1856_v63 = vpop.eup %1855 }
0x27d0   :  { %1360 = vrot.lane.b32.xlu1 %v1856_v63, %s1866_s16 }
0x2842   :  { %v1361_v2 = vpop.permute.xlu1 %1360 }
0x2843   :  { %v1363_v4 = vmul.f32 %v1361_v2, %v1342_v57 }
0x2845   :  { %v1364_v7 = vpack.c.bf16 %v1363_v4, %v1363_v4 }
0x2847   :  { %v1366_v8 = vrot.slane %v1364_v7, 2 }
0x2849   :  { %1367 = vrot.lane.b32.xlu0 %v1366_v8, %s1867_s3 }
0x28bb   :  { %v1368_v10 = vpop.permute.xlu0 %1367 }
0x28bc   :  { %1742 = vmatmul.mubr.msk.bf16.vlgmr.msra.gmra.mxu1 %vm113_vm3, %v1368_v10 }
0x297c   :  { %v1406_v12 = vpop.f32.mrf.mxu1 }
0x297d   :  { %v1413_v11 = vrot.slane %v1406_v12, 2 }
0x297e   :  { %v1743_v13 = vpop.f32.mrf.mxu1 }
0x297f   :  { %v1415_v14 = vadd.f32 %v1413_v11, %v2125_v37  ;;  %v1765_v37 = vld [vmem:[%s2225_s7 + $0x8] sm:$0xff]  }
0x2980   :  { %v1409_v15 = vpop.f32.mrf.mxu1  ;;  %1746 = vmatpush3.bf16.msra.mxu0 %v1765_v37 }
0x2981   :  { %1857 = vtanh.f32 %v1415_v14  ;;  %v1416_v16 = vmul.f32 0.5, %v1415_v14  ;;  %1747 = vmatprep.subr.bf16.mxu0 %v1863_v0 }
0x2982   :  { %v1744_v3 = vpop.f32.mrf.mxu1 }
0x2983   :  { %1859 = vtanh.f32 %v1416_v16 }
0x2984   :  { %1748 = vmatpush3.bf16.msra.mxu0 %v1766_v23 }
0x298e   :  { %v1858_v31 = vpop.eup %1857 }
0x298f   :  { %1426 = vrot.lane.b32.xlu1 %v1858_v31, %s1866_s16 }
0x2990   :  { %v1860_v18 = vpop.eup %1859 }
0x2991   :  { %v1418_v19 = vadd.f32 1.0, %v1860_v18 }
0x2993   :  { %v1419_v53 = vmul.f32 0.5, %v1418_v19 }
0x2995   :  { %v1424_v5 = vmul.f32 %v1422_v6, %v1419_v53 }
0x2a01   :  { %v1427_v41 = vpop.permute.xlu1 %1426 }
0x2a02   :  { %v1429_v20 = vmul.f32 %v1427_v41, %v1419_v53 }
0x2a04   :  { %1431 = vrot.lane.b32.xlu0 %v1429_v20, %s1867_s3 }
0x2a76   :  { %v1432_v21 = vpop.permute.xlu0 %1431 }
0x2a77   :  { %v1434_v22 = vadd.f32 %v1432_v21, %v1424_v5 }
0x2a79   :  { %1861 = vtanh.f32 %v1434_v22 }
0x2a86   :  { %v1862_v24 = vpop.eup %1861 }
0x2a87   :  { %1437 = vrot.lane.b32.xlu1 %v1862_v24, %s1866_s16 }
0x2af9   :  { %v1438_v25 = vpop.permute.xlu1 %1437 }
0x2afa   :  { %v1440_v26 = vmul.f32 %v1438_v25, %v1419_v53 }
0x2afc   :  { %v1441_v27 = vpack.c.bf16 %v1440_v26, %v1440_v26 }
0x2afe   :  { %v1454_v28 = vrot.slane %v1441_v27, 3 }
0x2b00   :  { %1455 = vrot.lane.b32.xlu0 %v1454_v28, %s1867_s3 }
0x2b72   :  { %v1456_v29 = vpop.permute.xlu0 %1455 }
0x2b73   :  { %1750 = vmatmul.mubr.msk.bf16.vlgmr.msra.gmra.mxu0 %vm113_vm3, %v1456_v29 }
0x2c33   :  { %v1506_v30 = vpop.f32.mrf.mxu0 }
0x2c34   :  { %v1507_v0 = vadd.f32 %v1543_v1, %v1506_v30 }
0x2c35   :  { %v1751_v32 = vpop.f32.mrf.mxu0 }
0x2c36   :  { %1513 = vst.msk [vmem:[%s2227_s9] sm:$0x3] %vm1512_vm8, %v1507_v0 }
0x2c37   :  { %v1509_v34 = vpop.f32.mrf.mxu0 }
0x2c39   :  { %v1752_v35 = vpop.f32.mrf.mxu0 }

</bundles_post_ra>
